<compile_context>
chip_gen: v7x
topology: tpu7x:2x2x1
jax: 0.10.0
libtpu: 0.0.40
codegen_flags: <defaults>
</compile_context>

<pallas_src>
import jax
import jax.numpy as jnp
from jax import lax
from jax.experimental import pallas as pl
from jax.experimental.pallas import tpu as pltpu


def _rnn_forward_kernel(x_ref, len_ref, wtok0_ref, wslab_ref, bslab_ref, out_ref):
    TB = x_ref.shape[0]                  # T * B_pad (time-major, flattened)
    B = len_ref.shape[0]                 # padded batch
    T = TB // B
    Vp, H = wtok0_ref.shape              # lane-padded vocab, padded hidden
    Op = out_ref.shape[1]                # padded output width
    f32 = jnp.float32
    bf16 = jnp.bfloat16

    # ---- hoisted, loop-invariant work (off the serial dependency chain) ----
    lengths = len_ref[...]                                       # (B, 1) int32
    # recurrent bf16 weights held in vregs across the unrolled loop (3 * 8 vregs)
    whh0 = wslab_ref[0 * H:1 * H, :H]
    wih1 = wslab_ref[1 * H:2 * H, :H]
    whh1 = wslab_ref[2 * H:3 * H, :H]
    b0 = bslab_ref[0:1, :H]
    b1 = jnp.broadcast_to(bslab_ref[1:2, :H], (B, H))            # broadcast once

    # Layer-0 input projection for ALL time steps in one MXU pass, kept as a value:
    # fused embedding lookup (exact one-hot matmul) @ (embed @ W_ih0) + b0.
    onehot = (x_ref[...] ==
              lax.broadcasted_iota(jnp.int32, (TB, Vp), 1)).astype(bf16)
    xproj = (jnp.dot(onehot, wtok0_ref[...], preferred_element_type=f32)
             + jnp.broadcast_to(b0, (TB, H)))                    # (T*B, H) f32

    # ---- recurrence: fully unrolled, static slice offsets, un-fused layer-1 ----
    h0 = jnp.zeros((B, H), f32)
    h1 = jnp.zeros((B, H), f32)
    for t in range(T):
        x0 = xproj[t * B:(t + 1) * B, :]                         # static slice
        # h1@Whh1 only depends on previous h1 -> can issue while layer-0 is in flight
        p1h = jnp.dot(h1.astype(bf16), whh1, preferred_element_type=f32)
        h0n = jnp.tanh(x0 + jnp.dot(h0.astype(bf16), whh0,
                                    preferred_element_type=f32))
        h1n = jnp.tanh(jnp.dot(h0n.astype(bf16), wih1,
                               preferred_element_type=f32) + p1h + b1)
        # pack_padded_sequence semantics: freeze hidden once t >= length
        valid = t < lengths                                      # (B, 1) bool
        h0 = jnp.where(valid, h0n, h0)
        h1 = jnp.where(valid, h1n, h1)

    # ---- head: dense1 -> ReLU -> dropout(eval == identity) -> dense2 ----
    # (head weights loaded only now -> not live during the recurrence)
    wd1 = wslab_ref[3 * H:4 * H, :H]
    wd2 = wslab_ref[4 * H:5 * H, :Op]
    bd1 = bslab_ref[2:3, :H]
    bd2 = bslab_ref[3:4, :Op]
    z = jnp.maximum(jnp.dot(h1.astype(bf16), wd1,
                            preferred_element_type=f32) + bd1, 0.0)
    out_ref[...] = (jnp.dot(z.astype(bf16), wd2,
                            preferred_element_type=f32) + bd2)


def _round_up(x, m):
    return ((x + m - 1) // m) * m


def rnn_nationality_predictor(X, lengths, params):
    """X: (B, T) int32 token ids; lengths: (B,) int32; returns (B, output_size) f32."""
    B, T = X.shape
    V = params["embed"].shape[0]
    H = params["whh0"].shape[0]
    OUT = params["wd2"].shape[1]

    Bp = _round_up(max(B, 8), 8)       # sublane-dense batch
    Hp = _round_up(H, 128)             # lane-dense hidden
    Op = _round_up(OUT, 128)           # lane-dense output -> unmasked vst stores
    Vp = _round_up(V, 128)             # lane-dense one-hot / K-aligned matmul
    W = max(Hp, Op)                    # common lane width of the stacked slabs

    f32 = jnp.float32
    bf16 = jnp.bfloat16

    def pad2(a, r, c):
        return jnp.pad(a, ((0, r - a.shape[0]), (0, c - a.shape[1])))

    # One-time algebraic weight transforms (zero-padding keeps padded lanes exactly
    # zero through tanh/ReLU, so the math is unchanged):
    #  * fold the embedding table into the layer-0 input projection (exact)
    #  * stack all weight matrices / bias rows into two slabs (fewer entry DMAs)
    #  * cast weights to bf16 (biases / state / accumulation stay f32)
    wtok0 = pad2(params["embed"].astype(f32) @ params["wih0"], Vp, Hp).astype(bf16)
    wslab = jnp.concatenate([
        pad2(params["whh0"], Hp, W),
        pad2(params["wih1"], Hp, W),
        pad2(params["whh1"], Hp, W),
        pad2(params["wd1"], Hp, W),
        pad2(params["wd2"], Hp, W),
    ], axis=0).astype(bf16)                                        # (5*Hp, W)
    bslab = jnp.concatenate([
        pad2(params["b0"], 1, W),
        pad2(params["b1"], 1, W),
        pad2(params["bd1"], 1, W),
        pad2(params["bd2"], 1, W),
    ], axis=0).astype(f32)                                         # (4, W)

    # Token ids: time-major, batch padded with padding_idx=0, flattened to
    # (T*Bp, 1) so the in-kernel one-hot needs no layout-crossing reshape.
    ids = jnp.pad(X.astype(jnp.int32).T, ((0, 0), (0, Bp - B))).reshape(T * Bp, 1)
    lens = jnp.pad(lengths.astype(jnp.int32).reshape(B, 1), ((0, Bp - B), (0, 0)))

    vmem = pl.BlockSpec(memory_space=pltpu.MemorySpace.VMEM)
    out = pl.pallas_call(
        _rnn_forward_kernel,
        out_shape=jax.ShapeDtypeStruct((Bp, Op), f32),
        in_specs=[vmem] * 5,
        out_specs=vmem,
    )(ids, lens, wtok0, wslab, bslab)
    return out[:B, :OUT]


def init_params(key, vocab, embedding_dim, hidden_size, output_size):
    ks = jax.random.split(key, 12)
    s = 0.1
    embed = s * jax.random.normal(ks[0], (vocab, embedding_dim), jnp.float32)
    embed = embed.at[0].set(0.0)                # padding_idx=0
    params = {
        "embed": embed,
        # layer 0: input E -> H   (stored transposed vs PyTorch so we right-multiply)
        "wih0": s * jax.random.normal(ks[1], (embedding_dim, hidden_size), jnp.float32),
        "whh0": s * jax.random.normal(ks[2], (hidden_size, hidden_size), jnp.float32),
        "b0":   s * jax.random.normal(ks[3], (1, hidden_size), jnp.float32),  # b_ih + b_hh folded
        # layer 1: H -> H
        "wih1": s * jax.random.normal(ks[4], (hidden_size, hidden_size), jnp.float32),
        "whh1": s * jax.random.normal(ks[5], (hidden_size, hidden_size), jnp.float32),
        "b1":   s * jax.random.normal(ks[6], (1, hidden_size), jnp.float32),
        # dense heads
        "wd1":  s * jax.random.normal(ks[7], (hidden_size, hidden_size), jnp.float32),
        "bd1":  s * jax.random.normal(ks[8], (1, hidden_size), jnp.float32),
        "wd2":  s * jax.random.normal(ks[9], (hidden_size, output_size), jnp.float32),
        "bd2":  s * jax.random.normal(ks[10], (1, output_size), jnp.float32),
    }
    return params


if __name__ == "__main__":
    # module config: input_size(vocab)=32, output_size=8, architecture='RNN',
    # embedding_dim=16, hidden_size=32, num_rnn_layers=2, dropout=0.0 (eval)
    B, T = 2, 8
    VOCAB, E, H, OUT = 32, 16, 32, 8

    key = jax.random.PRNGKey(0)
    kx, kp = jax.random.split(key)

    params = init_params(kp, VOCAB, E, H, OUT)

    lengths = jnp.array([8, 5], dtype=jnp.int32)
    X = jax.random.randint(kx, (B, T), minval=1, maxval=VOCAB, dtype=jnp.int32)
    # zero-pad token positions beyond each sequence's length (padding_idx=0)
    pos = jnp.arange(T)[None, :]
    X = jnp.where(pos < lengths[:, None], X, 0).astype(jnp.int32)

    fwd = jax.jit(rnn_nationality_predictor)
    logits = fwd(X, lengths, params)
    jax.block_until_ready(logits)
    assert logits.shape == (B, OUT) and logits.dtype == jnp.float32
    print("KERNEL_OK")
</pallas_src>

<mosaic_0001>
module attributes {stable_mosaic.version = 11 : i64} {
  func.func @_rnn_forward_kernel(%arg0: memref<64x1xi32, #tpu.memory_space<vmem>>, %arg1: memref<8x1xi32, #tpu.memory_space<vmem>>, %arg2: memref<128x128xbf16, #tpu.memory_space<vmem>>, %arg3: memref<640x128xbf16, #tpu.memory_space<vmem>>, %arg4: memref<4x128xf32, #tpu.memory_space<vmem>>, %arg5: memref<8x128xf32, #tpu.memory_space<vmem>>) attributes {dimension_semantics = [], scalar_prefetch = 0 : i64, scratch_operands = 0 : i64, tpu.core_type = #tpu.core_type<tc>} {
    %c0 = arith.constant 0 : index
    %c0_0 = arith.constant 0 : index
    %0 = vector.load %arg1[%c0, %c0_0] : memref<8x1xi32, #tpu.memory_space<vmem>>, vector<8x1xi32>
    %c0_1 = arith.constant 0 : index
    %c0_2 = arith.constant 0 : index
    %1 = vector.load %arg3[%c0_1, %c0_2] : memref<640x128xbf16, #tpu.memory_space<vmem>>, vector<128x128xbf16>
    %c128 = arith.constant 128 : index
    %c0_3 = arith.constant 0 : index
    %2 = vector.load %arg3[%c128, %c0_3] : memref<640x128xbf16, #tpu.memory_space<vmem>>, vector<128x128xbf16>
    %c256 = arith.constant 256 : index
    %c0_4 = arith.constant 0 : index
    %3 = vector.load %arg3[%c256, %c0_4] : memref<640x128xbf16, #tpu.memory_space<vmem>>, vector<128x128xbf16>
    %c0_5 = arith.constant 0 : index
    %c0_6 = arith.constant 0 : index
    %4 = vector.load %arg4[%c0_5, %c0_6] : memref<4x128xf32, #tpu.memory_space<vmem>>, vector<1x128xf32>
    %c1 = arith.constant 1 : index
    %c0_7 = arith.constant 0 : index
    %5 = vector.load %arg4[%c1, %c0_7] : memref<4x128xf32, #tpu.memory_space<vmem>>, vector<1x128xf32>
    %6 = vector.shape_cast %5 : vector<1x128xf32> to vector<1x128xf32>
    %7 = vector.broadcast %6 : vector<1x128xf32> to vector<8x128xf32>
    %c0_8 = arith.constant 0 : index
    %c0_9 = arith.constant 0 : index
    %8 = vector.load %arg0[%c0_8, %c0_9] : memref<64x1xi32, #tpu.memory_space<vmem>>, vector<64x1xi32>
    %9 = tpu.iota {dimensions = array<i32: 1>} : vector<64x128xi32>
    %10 = vector.broadcast %8 : vector<64x1xi32> to vector<64x128xi32>
    %11 = arith.cmpi eq, %10, %9 : vector<64x128xi32>
    %12 = arith.extui %11 : vector<64x128xi1> to vector<64x128xi32>
    %13 = arith.sitofp %12 : vector<64x128xi32> to vector<64x128xf32>
    %14 = arith.truncf %13 : vector<64x128xf32> to vector<64x128xbf16>
    %c0_10 = arith.constant 0 : index
    %c0_11 = arith.constant 0 : index
    %15 = vector.load %arg2[%c0_10, %c0_11] : memref<128x128xbf16, #tpu.memory_space<vmem>>, vector<128x128xbf16>
    %cst = arith.constant dense<0.000000e+00> : vector<64x128xf32>
    %16 = tpu.matmul %14, %15, %cst {dimension_numbers = #tpu.dot_dimension_numbers<[1], [0], [0], [1], [0, 0, 1, 1], [], []>} : vector<64x128xbf16>, vector<128x128xbf16>, vector<64x128xf32> -> vector<64x128xf32>
    %17 = vector.shape_cast %4 : vector<1x128xf32> to vector<1x128xf32>
    %18 = vector.broadcast %17 : vector<1x128xf32> to vector<64x128xf32>
    %19 = arith.addf %16, %18 : vector<64x128xf32>
    %cst_12 = arith.constant 0.000000e+00 : f32
    %20 = vector.broadcast %cst_12 : f32 to vector<8x128xf32>
    %cst_13 = arith.constant 0.000000e+00 : f32
    %21 = vector.broadcast %cst_13 : f32 to vector<8x128xf32>
    %22 = vector.extract_strided_slice %19 {offsets = [0, 0], sizes = [8, 128], strides = [1, 1]} : vector<64x128xf32> to vector<8x128xf32>
    %23 = arith.truncf %21 : vector<8x128xf32> to vector<8x128xbf16>
    %cst_14 = arith.constant dense<0.000000e+00> : vector<8x128xf32>
    %24 = tpu.matmul %23, %3, %cst_14 {dimension_numbers = #tpu.dot_dimension_numbers<[1], [0], [0], [1], [0, 0, 1, 1], [], []>} : vector<8x128xbf16>, vector<128x128xbf16>, vector<8x128xf32> -> vector<8x128xf32>
    %25 = arith.truncf %20 : vector<8x128xf32> to vector<8x128xbf16>
    %cst_15 = arith.constant dense<0.000000e+00> : vector<8x128xf32>
    %26 = tpu.matmul %25, %1, %cst_15 {dimension_numbers = #tpu.dot_dimension_numbers<[1], [0], [0], [1], [0, 0, 1, 1], [], []>} : vector<8x128xbf16>, vector<128x128xbf16>, vector<8x128xf32> -> vector<8x128xf32>
    %27 = arith.addf %22, %26 : vector<8x128xf32>
    %28 = math.tanh %27 : vector<8x128xf32>
    %29 = arith.truncf %28 : vector<8x128xf32> to vector<8x128xbf16>
    %cst_16 = arith.constant dense<0.000000e+00> : vector<8x128xf32>
    %30 = tpu.matmul %29, %2, %cst_16 {dimension_numbers = #tpu.dot_dimension_numbers<[1], [0], [0], [1], [0, 0, 1, 1], [], []>} : vector<8x128xbf16>, vector<128x128xbf16>, vector<8x128xf32> -> vector<8x128xf32>
    %31 = arith.addf %30, %24 : vector<8x128xf32>
    %32 = arith.addf %31, %7 : vector<8x128xf32>
    %33 = math.tanh %32 : vector<8x128xf32>
    %c0_i32 = arith.constant 0 : i32
    %34 = vector.broadcast %c0_i32 : i32 to vector<8x1xi32>
    %35 = arith.cmpi sgt, %0, %34 : vector<8x1xi32>
    %36 = vector.shape_cast %35 : vector<8x1xi1> to vector<8x1xi1>
    %37 = vector.broadcast %36 : vector<8x1xi1> to vector<8x128xi1>
    %38 = arith.select %37, %28, %20 : vector<8x128xi1>, vector<8x128xf32>
    %39 = vector.shape_cast %35 : vector<8x1xi1> to vector<8x1xi1>
    %40 = vector.broadcast %39 : vector<8x1xi1> to vector<8x128xi1>
    %41 = arith.select %40, %33, %21 : vector<8x128xi1>, vector<8x128xf32>
    %42 = vector.extract_strided_slice %19 {offsets = [8, 0], sizes = [8, 128], strides = [1, 1]} : vector<64x128xf32> to vector<8x128xf32>
    %43 = arith.truncf %41 : vector<8x128xf32> to vector<8x128xbf16>
    %cst_17 = arith.constant dense<0.000000e+00> : vector<8x128xf32>
    %44 = tpu.matmul %43, %3, %cst_17 {dimension_numbers = #tpu.dot_dimension_numbers<[1], [0], [0], [1], [0, 0, 1, 1], [], []>} : vector<8x128xbf16>, vector<128x128xbf16>, vector<8x128xf32> -> vector<8x128xf32>
    %45 = arith.truncf %38 : vector<8x128xf32> to vector<8x128xbf16>
    %cst_18 = arith.constant dense<0.000000e+00> : vector<8x128xf32>
    %46 = tpu.matmul %45, %1, %cst_18 {dimension_numbers = #tpu.dot_dimension_numbers<[1], [0], [0], [1], [0, 0, 1, 1], [], []>} : vector<8x128xbf16>, vector<128x128xbf16>, vector<8x128xf32> -> vector<8x128xf32>
    %47 = arith.addf %42, %46 : vector<8x128xf32>
    %48 = math.tanh %47 : vector<8x128xf32>
    %49 = arith.truncf %48 : vector<8x128xf32> to vector<8x128xbf16>
    %cst_19 = arith.constant dense<0.000000e+00> : vector<8x128xf32>
    %50 = tpu.matmul %49, %2, %cst_19 {dimension_numbers = #tpu.dot_dimension_numbers<[1], [0], [0], [1], [0, 0, 1, 1], [], []>} : vector<8x128xbf16>, vector<128x128xbf16>, vector<8x128xf32> -> vector<8x128xf32>
    %51 = arith.addf %50, %44 : vector<8x128xf32>
    %52 = arith.addf %51, %7 : vector<8x128xf32>
    %53 = math.tanh %52 : vector<8x128xf32>
    %c1_i32 = arith.constant 1 : i32
    %54 = vector.broadcast %c1_i32 : i32 to vector<8x1xi32>
    %55 = arith.cmpi sgt, %0, %54 : vector<8x1xi32>
    %56 = vector.shape_cast %55 : vector<8x1xi1> to vector<8x1xi1>
    %57 = vector.broadcast %56 : vector<8x1xi1> to vector<8x128xi1>
    %58 = arith.select %57, %48, %38 : vector<8x128xi1>, vector<8x128xf32>
    %59 = vector.shape_cast %55 : vector<8x1xi1> to vector<8x1xi1>
    %60 = vector.broadcast %59 : vector<8x1xi1> to vector<8x128xi1>
    %61 = arith.select %60, %53, %41 : vector<8x128xi1>, vector<8x128xf32>
    %62 = vector.extract_strided_slice %19 {offsets = [16, 0], sizes = [8, 128], strides = [1, 1]} : vector<64x128xf32> to vector<8x128xf32>
    %63 = arith.truncf %61 : vector<8x128xf32> to vector<8x128xbf16>
    %cst_20 = arith.constant dense<0.000000e+00> : vector<8x128xf32>
    %64 = tpu.matmul %63, %3, %cst_20 {dimension_numbers = #tpu.dot_dimension_numbers<[1], [0], [0], [1], [0, 0, 1, 1], [], []>} : vector<8x128xbf16>, vector<128x128xbf16>, vector<8x128xf32> -> vector<8x128xf32>
    %65 = arith.truncf %58 : vector<8x128xf32> to vector<8x128xbf16>
    %cst_21 = arith.constant dense<0.000000e+00> : vector<8x128xf32>
    %66 = tpu.matmul %65, %1, %cst_21 {dimension_numbers = #tpu.dot_dimension_numbers<[1], [0], [0], [1], [0, 0, 1, 1], [], []>} : vector<8x128xbf16>, vector<128x128xbf16>, vector<8x128xf32> -> vector<8x128xf32>
    %67 = arith.addf %62, %66 : vector<8x128xf32>
    %68 = math.tanh %67 : vector<8x128xf32>
    %69 = arith.truncf %68 : vector<8x128xf32> to vector<8x128xbf16>
    %cst_22 = arith.constant dense<0.000000e+00> : vector<8x128xf32>
    %70 = tpu.matmul %69, %2, %cst_22 {dimension_numbers = #tpu.dot_dimension_numbers<[1], [0], [0], [1], [0, 0, 1, 1], [], []>} : vector<8x128xbf16>, vector<128x128xbf16>, vector<8x128xf32> -> vector<8x128xf32>
    %71 = arith.addf %70, %64 : vector<8x128xf32>
    %72 = arith.addf %71, %7 : vector<8x128xf32>
    %73 = math.tanh %72 : vector<8x128xf32>
    %c2_i32 = arith.constant 2 : i32
    %74 = vector.broadcast %c2_i32 : i32 to vector<8x1xi32>
    %75 = arith.cmpi sgt, %0, %74 : vector<8x1xi32>
    %76 = vector.shape_cast %75 : vector<8x1xi1> to vector<8x1xi1>
    %77 = vector.broadcast %76 : vector<8x1xi1> to vector<8x128xi1>
    %78 = arith.select %77, %68, %58 : vector<8x128xi1>, vector<8x128xf32>
    %79 = vector.shape_cast %75 : vector<8x1xi1> to vector<8x1xi1>
    %80 = vector.broadcast %79 : vector<8x1xi1> to vector<8x128xi1>
    %81 = arith.select %80, %73, %61 : vector<8x128xi1>, vector<8x128xf32>
    %82 = vector.extract_strided_slice %19 {offsets = [24, 0], sizes = [8, 128], strides = [1, 1]} : vector<64x128xf32> to vector<8x128xf32>
    %83 = arith.truncf %81 : vector<8x128xf32> to vector<8x128xbf16>
    %cst_23 = arith.constant dense<0.000000e+00> : vector<8x128xf32>
    %84 = tpu.matmul %83, %3, %cst_23 {dimension_numbers = #tpu.dot_dimension_numbers<[1], [0], [0], [1], [0, 0, 1, 1], [], []>} : vector<8x128xbf16>, vector<128x128xbf16>, vector<8x128xf32> -> vector<8x128xf32>
    %85 = arith.truncf %78 : vector<8x128xf32> to vector<8x128xbf16>
    %cst_24 = arith.constant dense<0.000000e+00> : vector<8x128xf32>
    %86 = tpu.matmul %85, %1, %cst_24 {dimension_numbers = #tpu.dot_dimension_numbers<[1], [0], [0], [1], [0, 0, 1, 1], [], []>} : vector<8x128xbf16>, vector<128x128xbf16>, vector<8x128xf32> -> vector<8x128xf32>
    %87 = arith.addf %82, %86 : vector<8x128xf32>
    %88 = math.tanh %87 : vector<8x128xf32>
    %89 = arith.truncf %88 : vector<8x128xf32> to vector<8x128xbf16>
    %cst_25 = arith.constant dense<0.000000e+00> : vector<8x128xf32>
    %90 = tpu.matmul %89, %2, %cst_25 {dimension_numbers = #tpu.dot_dimension_numbers<[1], [0], [0], [1], [0, 0, 1, 1], [], []>} : vector<8x128xbf16>, vector<128x128xbf16>, vector<8x128xf32> -> vector<8x128xf32>
    %91 = arith.addf %90, %84 : vector<8x128xf32>
    %92 = arith.addf %91, %7 : vector<8x128xf32>
    %93 = math.tanh %92 : vector<8x128xf32>
    %c3_i32 = arith.constant 3 : i32
    %94 = vector.broadcast %c3_i32 : i32 to vector<8x1xi32>
    %95 = arith.cmpi sgt, %0, %94 : vector<8x1xi32>
    %96 = vector.shape_cast %95 : vector<8x1xi1> to vector<8x1xi1>
    %97 = vector.broadcast %96 : vector<8x1xi1> to vector<8x128xi1>
    %98 = arith.select %97, %88, %78 : vector<8x128xi1>, vector<8x128xf32>
    %99 = vector.shape_cast %95 : vector<8x1xi1> to vector<8x1xi1>
    %100 = vector.broadcast %99 : vector<8x1xi1> to vector<8x128xi1>
    %101 = arith.select %100, %93, %81 : vector<8x128xi1>, vector<8x128xf32>
    %102 = vector.extract_strided_slice %19 {offsets = [32, 0], sizes = [8, 128], strides = [1, 1]} : vector<64x128xf32> to vector<8x128xf32>
    %103 = arith.truncf %101 : vector<8x128xf32> to vector<8x128xbf16>
    %cst_26 = arith.constant dense<0.000000e+00> : vector<8x128xf32>
    %104 = tpu.matmul %103, %3, %cst_26 {dimension_numbers = #tpu.dot_dimension_numbers<[1], [0], [0], [1], [0, 0, 1, 1], [], []>} : vector<8x128xbf16>, vector<128x128xbf16>, vector<8x128xf32> -> vector<8x128xf32>
    %105 = arith.truncf %98 : vector<8x128xf32> to vector<8x128xbf16>
    %cst_27 = arith.constant dense<0.000000e+00> : vector<8x128xf32>
    %106 = tpu.matmul %105, %1, %cst_27 {dimension_numbers = #tpu.dot_dimension_numbers<[1], [0], [0], [1], [0, 0, 1, 1], [], []>} : vector<8x128xbf16>, vector<128x128xbf16>, vector<8x128xf32> -> vector<8x128xf32>
    %107 = arith.addf %102, %106 : vector<8x128xf32>
    %108 = math.tanh %107 : vector<8x128xf32>
    %109 = arith.truncf %108 : vector<8x128xf32> to vector<8x128xbf16>
    %cst_28 = arith.constant dense<0.000000e+00> : vector<8x128xf32>
    %110 = tpu.matmul %109, %2, %cst_28 {dimension_numbers = #tpu.dot_dimension_numbers<[1], [0], [0], [1], [0, 0, 1, 1], [], []>} : vector<8x128xbf16>, vector<128x128xbf16>, vector<8x128xf32> -> vector<8x128xf32>
    %111 = arith.addf %110, %104 : vector<8x128xf32>
    %112 = arith.addf %111, %7 : vector<8x128xf32>
    %113 = math.tanh %112 : vector<8x128xf32>
    %c4_i32 = arith.constant 4 : i32
    %114 = vector.broadcast %c4_i32 : i32 to vector<8x1xi32>
    %115 = arith.cmpi sgt, %0, %114 : vector<8x1xi32>
    %116 = vector.shape_cast %115 : vector<8x1xi1> to vector<8x1xi1>
    %117 = vector.broadcast %116 : vector<8x1xi1> to vector<8x128xi1>
    %118 = arith.select %117, %108, %98 : vector<8x128xi1>, vector<8x128xf32>
    %119 = vector.shape_cast %115 : vector<8x1xi1> to vector<8x1xi1>
    %120 = vector.broadcast %119 : vector<8x1xi1> to vector<8x128xi1>
    %121 = arith.select %120, %113, %101 : vector<8x128xi1>, vector<8x128xf32>
    %122 = vector.extract_strided_slice %19 {offsets = [40, 0], sizes = [8, 128], strides = [1, 1]} : vector<64x128xf32> to vector<8x128xf32>
    %123 = arith.truncf %121 : vector<8x128xf32> to vector<8x128xbf16>
    %cst_29 = arith.constant dense<0.000000e+00> : vector<8x128xf32>
    %124 = tpu.matmul %123, %3, %cst_29 {dimension_numbers = #tpu.dot_dimension_numbers<[1], [0], [0], [1], [0, 0, 1, 1], [], []>} : vector<8x128xbf16>, vector<128x128xbf16>, vector<8x128xf32> -> vector<8x128xf32>
    %125 = arith.truncf %118 : vector<8x128xf32> to vector<8x128xbf16>
    %cst_30 = arith.constant dense<0.000000e+00> : vector<8x128xf32>
    %126 = tpu.matmul %125, %1, %cst_30 {dimension_numbers = #tpu.dot_dimension_numbers<[1], [0], [0], [1], [0, 0, 1, 1], [], []>} : vector<8x128xbf16>, vector<128x128xbf16>, vector<8x128xf32> -> vector<8x128xf32>
    %127 = arith.addf %122, %126 : vector<8x128xf32>
    %128 = math.tanh %127 : vector<8x128xf32>
    %129 = arith.truncf %128 : vector<8x128xf32> to vector<8x128xbf16>
    %cst_31 = arith.constant dense<0.000000e+00> : vector<8x128xf32>
    %130 = tpu.matmul %129, %2, %cst_31 {dimension_numbers = #tpu.dot_dimension_numbers<[1], [0], [0], [1], [0, 0, 1, 1], [], []>} : vector<8x128xbf16>, vector<128x128xbf16>, vector<8x128xf32> -> vector<8x128xf32>
    %131 = arith.addf %130, %124 : vector<8x128xf32>
    %132 = arith.addf %131, %7 : vector<8x128xf32>
    %133 = math.tanh %132 : vector<8x128xf32>
    %c5_i32 = arith.constant 5 : i32
    %134 = vector.broadcast %c5_i32 : i32 to vector<8x1xi32>
    %135 = arith.cmpi sgt, %0, %134 : vector<8x1xi32>
    %136 = vector.shape_cast %135 : vector<8x1xi1> to vector<8x1xi1>
    %137 = vector.broadcast %136 : vector<8x1xi1> to vector<8x128xi1>
    %138 = arith.select %137, %128, %118 : vector<8x128xi1>, vector<8x128xf32>
    %139 = vector.shape_cast %135 : vector<8x1xi1> to vector<8x1xi1>
    %140 = vector.broadcast %139 : vector<8x1xi1> to vector<8x128xi1>
    %141 = arith.select %140, %133, %121 : vector<8x128xi1>, vector<8x128xf32>
    %142 = vector.extract_strided_slice %19 {offsets = [48, 0], sizes = [8, 128], strides = [1, 1]} : vector<64x128xf32> to vector<8x128xf32>
    %143 = arith.truncf %141 : vector<8x128xf32> to vector<8x128xbf16>
    %cst_32 = arith.constant dense<0.000000e+00> : vector<8x128xf32>
    %144 = tpu.matmul %143, %3, %cst_32 {dimension_numbers = #tpu.dot_dimension_numbers<[1], [0], [0], [1], [0, 0, 1, 1], [], []>} : vector<8x128xbf16>, vector<128x128xbf16>, vector<8x128xf32> -> vector<8x128xf32>
    %145 = arith.truncf %138 : vector<8x128xf32> to vector<8x128xbf16>
    %cst_33 = arith.constant dense<0.000000e+00> : vector<8x128xf32>
    %146 = tpu.matmul %145, %1, %cst_33 {dimension_numbers = #tpu.dot_dimension_numbers<[1], [0], [0], [1], [0, 0, 1, 1], [], []>} : vector<8x128xbf16>, vector<128x128xbf16>, vector<8x128xf32> -> vector<8x128xf32>
    %147 = arith.addf %142, %146 : vector<8x128xf32>
    %148 = math.tanh %147 : vector<8x128xf32>
    %149 = arith.truncf %148 : vector<8x128xf32> to vector<8x128xbf16>
    %cst_34 = arith.constant dense<0.000000e+00> : vector<8x128xf32>
    %150 = tpu.matmul %149, %2, %cst_34 {dimension_numbers = #tpu.dot_dimension_numbers<[1], [0], [0], [1], [0, 0, 1, 1], [], []>} : vector<8x128xbf16>, vector<128x128xbf16>, vector<8x128xf32> -> vector<8x128xf32>
    %151 = arith.addf %150, %144 : vector<8x128xf32>
    %152 = arith.addf %151, %7 : vector<8x128xf32>
    %153 = math.tanh %152 : vector<8x128xf32>
    %c6_i32 = arith.constant 6 : i32
    %154 = vector.broadcast %c6_i32 : i32 to vector<8x1xi32>
    %155 = arith.cmpi sgt, %0, %154 : vector<8x1xi32>
    %156 = vector.shape_cast %155 : vector<8x1xi1> to vector<8x1xi1>
    %157 = vector.broadcast %156 : vector<8x1xi1> to vector<8x128xi1>
    %158 = arith.select %157, %148, %138 : vector<8x128xi1>, vector<8x128xf32>
    %159 = vector.shape_cast %155 : vector<8x1xi1> to vector<8x1xi1>
    %160 = vector.broadcast %159 : vector<8x1xi1> to vector<8x128xi1>
    %161 = arith.select %160, %153, %141 : vector<8x128xi1>, vector<8x128xf32>
    %162 = vector.extract_strided_slice %19 {offsets = [56, 0], sizes = [8, 128], strides = [1, 1]} : vector<64x128xf32> to vector<8x128xf32>
    %163 = arith.truncf %161 : vector<8x128xf32> to vector<8x128xbf16>
    %cst_35 = arith.constant dense<0.000000e+00> : vector<8x128xf32>
    %164 = tpu.matmul %163, %3, %cst_35 {dimension_numbers = #tpu.dot_dimension_numbers<[1], [0], [0], [1], [0, 0, 1, 1], [], []>} : vector<8x128xbf16>, vector<128x128xbf16>, vector<8x128xf32> -> vector<8x128xf32>
    %165 = arith.truncf %158 : vector<8x128xf32> to vector<8x128xbf16>
    %cst_36 = arith.constant dense<0.000000e+00> : vector<8x128xf32>
    %166 = tpu.matmul %165, %1, %cst_36 {dimension_numbers = #tpu.dot_dimension_numbers<[1], [0], [0], [1], [0, 0, 1, 1], [], []>} : vector<8x128xbf16>, vector<128x128xbf16>, vector<8x128xf32> -> vector<8x128xf32>
    %167 = arith.addf %162, %166 : vector<8x128xf32>
    %168 = math.tanh %167 : vector<8x128xf32>
    %169 = arith.truncf %168 : vector<8x128xf32> to vector<8x128xbf16>
    %cst_37 = arith.constant dense<0.000000e+00> : vector<8x128xf32>
    %170 = tpu.matmul %169, %2, %cst_37 {dimension_numbers = #tpu.dot_dimension_numbers<[1], [0], [0], [1], [0, 0, 1, 1], [], []>} : vector<8x128xbf16>, vector<128x128xbf16>, vector<8x128xf32> -> vector<8x128xf32>
    %171 = arith.addf %170, %164 : vector<8x128xf32>
    %172 = arith.addf %171, %7 : vector<8x128xf32>
    %173 = math.tanh %172 : vector<8x128xf32>
    %c7_i32 = arith.constant 7 : i32
    %174 = vector.broadcast %c7_i32 : i32 to vector<8x1xi32>
    %175 = arith.cmpi sgt, %0, %174 : vector<8x1xi32>
    %176 = vector.shape_cast %175 : vector<8x1xi1> to vector<8x1xi1>
    %177 = vector.broadcast %176 : vector<8x1xi1> to vector<8x128xi1>
    %178 = arith.select %177, %173, %161 : vector<8x128xi1>, vector<8x128xf32>
    %c384 = arith.constant 384 : index
    %c0_38 = arith.constant 0 : index
    %179 = vector.load %arg3[%c384, %c0_38] : memref<640x128xbf16, #tpu.memory_space<vmem>>, vector<128x128xbf16>
    %c512 = arith.constant 512 : index
    %c0_39 = arith.constant 0 : index
    %180 = vector.load %arg3[%c512, %c0_39] : memref<640x128xbf16, #tpu.memory_space<vmem>>, vector<128x128xbf16>
    %c2 = arith.constant 2 : index
    %c0_40 = arith.constant 0 : index
    %181 = vector.load %arg4[%c2, %c0_40] : memref<4x128xf32, #tpu.memory_space<vmem>>, vector<1x128xf32>
    %c3 = arith.constant 3 : index
    %c0_41 = arith.constant 0 : index
    %182 = vector.load %arg4[%c3, %c0_41] : memref<4x128xf32, #tpu.memory_space<vmem>>, vector<1x128xf32>
    %183 = arith.truncf %178 : vector<8x128xf32> to vector<8x128xbf16>
    %cst_42 = arith.constant dense<0.000000e+00> : vector<8x128xf32>
    %184 = tpu.matmul %183, %179, %cst_42 {dimension_numbers = #tpu.dot_dimension_numbers<[1], [0], [0], [1], [0, 0, 1, 1], [], []>} : vector<8x128xbf16>, vector<128x128xbf16>, vector<8x128xf32> -> vector<8x128xf32>
    %185 = vector.broadcast %181 : vector<1x128xf32> to vector<8x128xf32>
    %186 = arith.addf %184, %185 : vector<8x128xf32>
    %cst_43 = arith.constant 0.000000e+00 : f32
    %187 = vector.broadcast %cst_43 : f32 to vector<8x128xf32>
    %188 = arith.maximumf %186, %187 : vector<8x128xf32>
    %189 = arith.truncf %188 : vector<8x128xf32> to vector<8x128xbf16>
    %cst_44 = arith.constant dense<0.000000e+00> : vector<8x128xf32>
    %190 = tpu.matmul %189, %180, %cst_44 {dimension_numbers = #tpu.dot_dimension_numbers<[1], [0], [0], [1], [0, 0, 1, 1], [], []>} : vector<8x128xbf16>, vector<128x128xbf16>, vector<8x128xf32> -> vector<8x128xf32>
    %191 = vector.broadcast %182 : vector<1x128xf32> to vector<8x128xf32>
    %192 = arith.addf %190, %191 : vector<8x128xf32>
    %c0_45 = arith.constant 0 : index
    %c0_46 = arith.constant 0 : index
    %193 = vector.load %arg5[%c0_45, %c0_46] : memref<8x128xf32, #tpu.memory_space<vmem>>, vector<8x128xf32>
    tpu.vector_store %arg5[%c0_45, %c0_46], %192 {strides = array<i32>} : memref<8x128xf32, #tpu.memory_space<vmem>>, vector<8x128xf32>,
    return
  }
}

</mosaic_0001>

<bundles_post_ra>
// kernel: rnn_nationality_predictor.1
= control target key start
LH: loop header
LB: loop body
LE: loop exit
PB: predicated region body
PF: predicated region fallthrough
CT: control target
= control target key end

     0   :  { %v2690_v0 = vmov 0   ;;  %v2691_v13 = vmov 0.0   ;;  %vm2692_vm8 = vmmov 0   ;;  %v84_v32 = vlaneseq  ;;  %s3598_s0 = inlined_call_operand.vmem [shape: s32[64,1], index: 0, kind: input, shape index: {}]   ;;  %s3599_s1 = inlined_call_operand.vmem [shape: s32[8,1], index: 1, kind: input, shape index: {}]   ;;  %s3600_s2 = inlined_call_operand.vmem [shape: bf16[128,128], index: 2, kind: input, shape index: {}]   ;;  %s3601_s3 = inlined_call_operand.vmem [shape: bf16[640,128], index: 3, kind: input, shape index: {}]   ;;  %s3602_s4 = inlined_call_operand.vmem [shape: f32[4,128], index: 4, kind: input, shape index: {}]   ;;  %s3603_s5 = inlined_call_operand.vmem [shape: f32[8,128], index: 5, kind: output, shape index: {}]  }
   0x1   :  { %2587 = vset.pattern.permute.xlu1 %v2690_v0  ;;  %2586 = vset.pattern.permute.xlu0 %v2690_v0  ;;  %v78_v1 = vld [vmem:[%s3598_s0 + $0x10] sm:$0xff]  ;;  %v76_v2 = vld [vmem:[%s3598_s0] sm:$0xff]  ;;  %v79_v3 = vld [vmem:[%s3598_s0 + $0x18] sm:$0xff]  ;;  %v2693_v39 = vmov 1.0|1.0  }
   0x2   :  { %93 = vperm.xlu1 %2587, %v78_v1   ;;  %87 = vperm.xlu0 %2586, %v76_v2   ;;  %v77_v4 = vld [vmem:[%s3598_s0 + $0x8] sm:$0xff]  ;;  %v21_v6 = vld [vmem:[%s3599_s1] sm:$0xff]  ;;  %v83_v10 = vld [vmem:[%s3598_s0 + $0x38] sm:$0xff]  ;;  %v85_v35 = vand.u32 127, %v84_v32 }
   0x3   :  { %v81_v5 = vld [vmem:[%s3598_s0 + $0x28] sm:$0xff]  ;;  %v2588_v7 = vld [vmem:[%s3600_s2] sm:$0xff]   ;;  %v82_v11 = vld [vmem:[%s3598_s0 + $0x30] sm:$0xff]  ;;  %vm675_vm0 = vcmp.gt.s32.totalorder %v21_v6, 1  ;;  %vm540_vm1 = vcmp.gt.s32.totalorder %v21_v6, 0  ;;  %vm945_vm2 = vcmp.gt.s32.totalorder %v21_v6, 3  ;;  %2062 = vmatprep.subr.bf16.mxu1 %v2691_v13  ;;  %2078 = vmatprep.mubr.msk.bf16.mxu1 %vm2692_vm8, %v2691_v13 }
   0x4   :  { %v80_v8 = vld [vmem:[%s3598_s0 + $0x20] sm:$0xff]  ;;  %v2589_v9 = vld [vmem:[%s3600_s2 + $0x8] sm:$0xff]   ;;  %2038 = vmatprep.subr.bf16.mxu0 %v2588_v7  ;;  %vm810_vm3 = vcmp.gt.s32.totalorder %v21_v6, 2  ;;  %v2590_v12 = vld [vmem:[%s3600_s2 + $0x10] sm:$0xff]   ;;  %v676_v14 = vsel %vm675_vm0, 1, %v2690_v0  ;;  %v541_v15 = vsel %vm540_vm1, 1, %v2690_v0 }
   0x5   :  { %2039 = vmatpush3.bf16.msra.mxu0 %v2588_v7  ;;  %v946_v16 = vsel %vm945_vm2, 1, %v2690_v0  ;;  %vm1215_vm4 = vcmp.gt.s32.totalorder %v21_v6, 5  ;;  %v811_v17 = vsel %vm810_vm3, 1, %v2690_v0  ;;  %vm1080_vm5 = vcmp.gt.s32.totalorder %v21_v6, 4  ;;  %v2591_v18 = vld [vmem:[%s3600_s2 + $0x18] sm:$0xff]   ;;  %v2592_v21 = vld [vmem:[%s3600_s2 + $0x20] sm:$0xff]  }
   0x6   :  { %96 = vperm.xlu1 %2587, %v79_v3   ;;  %90 = vperm.xlu0 %2586, %v77_v4   ;;  %vm1485_vm6 = vcmp.gt.s32.totalorder %v21_v6, 7  ;;  %v1216_v19 = vsel %vm1215_vm4, 1, %v2690_v0  ;;  %vm1350_vm7 = vcmp.gt.s32.totalorder %v21_v6, 6  ;;  %v1081_v20 = vsel %vm1080_vm5, 1, %v2690_v0  ;;  %v2593_v23 = vld [vmem:[%s3600_s2 + $0x28] sm:$0xff]   ;;  %v2594_v25 = vld [vmem:[%s3600_s2 + $0x30] sm:$0xff]  }
   0x7   :  { %2040 = vmatprep.subr.bf16.mxu0 %v2589_v9  ;;  %v1486_v22 = vsel %vm1485_vm6, 1, %v2690_v0  ;;  %v1351_v24 = vsel %vm1350_vm7, 1, %v2690_v0  ;;  %v2595_v26 = vld [vmem:[%s3600_s2 + $0x38] sm:$0xff]   ;;  %v2792_v27 = vld [vmem:[%s3601_s3 + $0x80] sm:$0xff]   ;;  %v2797_v28 = vld [vmem:[%s3601_s3 + $0x88] sm:$0xff]  }
   0x8   :  { %2063 = vmatpush3.bf16.msra.mxu1 %v2792_v27  ;;  %v2805_v29 = vld [vmem:[%s3601_s3 + $0x90] sm:$0xff]   ;;  %v2812_v30 = vld [vmem:[%s3601_s3 + $0x98] sm:$0xff]   ;;  %v2819_v31 = vld [vmem:[%s3601_s3 + $0xa0] sm:$0xff]  }
   0x9   :  { %2041 = vmatpush3.bf16.msra.mxu0 %v2589_v9  ;;  %2064 = vmatprep.subr.bf16.mxu1 %v2691_v13  ;;  %v2827_v38 = vld [vmem:[%s3601_s3] sm:$0xff]   ;;  %v2833_v42 = vld [vmem:[%s3601_s3 + $0x8] sm:$0xff]   ;;  %v2840_v45 = vld [vmem:[%s3601_s3 + $0x10] sm:$0xff]  }
   0xa   :  { %102 = vperm.xlu1 %2587, %v81_v5   ;;  %99 = vperm.xlu0 %2586, %v80_v8   ;;  %v2847_v46 = vld [vmem:[%s3601_s3 + $0x18] sm:$0xff]   ;;  %v2856_v47 = vld [vmem:[%s3601_s3 + $0x20] sm:$0xff]   ;;  %v2863_v48 = vld [vmem:[%s3601_s3 + $0x28] sm:$0xff]  }
   0xb   :  { %2042 = vmatprep.subr.bf16.mxu0 %v2590_v12  ;;  %v2870_v49 = vld [vmem:[%s3601_s3 + $0x30] sm:$0xff]   ;;  %v2877_v50 = vld [vmem:[%s3601_s3 + $0x38] sm:$0xff]   ;;  %v2898_v51 = vld [vmem:[%s3601_s3 + $0xa8] sm:$0xff]  }
   0xc   :  { %2065 = vmatpush3.bf16.msra.mxu1 %v2797_v28  ;;  %v2906_v52 = vld [vmem:[%s3601_s3 + $0xb0] sm:$0xff]   ;;  %v2916_v53 = vld [vmem:[%s3601_s3 + $0xb8] sm:$0xff]   ;;  %v2924_v54 = vld [vmem:[%s3601_s3 + $0x40] sm:$0xff]  }
   0xd   :  { %2043 = vmatpush3.bf16.msra.mxu0 %v2590_v12  ;;  %2066 = vmatprep.subr.bf16.mxu1 %v2691_v13  ;;  %v2932_v55 = vld [vmem:[%s3601_s3 + $0x48] sm:$0xff]   ;;  %v2941_v56 = vld [vmem:[%s3601_s3 + $0x50] sm:$0xff]   ;;  %v2948_v57 = vld [vmem:[%s3601_s3 + $0x58] sm:$0xff]  }
   0xe   :  { %108 = vperm.xlu1 %2587, %v83_v10   ;;  %105 = vperm.xlu0 %2586, %v82_v11   ;;  %v2956_v58 = vld [vmem:[%s3601_s3 + $0x60] sm:$0xff]   ;;  %v2963_v59 = vld [vmem:[%s3601_s3 + $0x68] sm:$0xff]   ;;  %v2969_v60 = vld [vmem:[%s3601_s3 + $0x70] sm:$0xff]  }
   0xf   :  { %2044 = vmatprep.subr.bf16.mxu0 %v2591_v18  ;;  %v2976_v61 = vld [vmem:[%s3601_s3 + $0x78] sm:$0xff]   ;;  %v1727_v62 = vld [vmem:[%s3602_s4] ss:$0 sm:$0xff] }
  0x10   :  { %2067 = vmatpush3.bf16.msra.mxu1 %v2805_v29 }
  0x11   :  { %2045 = vmatpush3.bf16.msra.mxu0 %v2591_v18  ;;  %2068 = vmatprep.subr.bf16.mxu1 %v2691_v13 }
  0x12   :  { %678 = vperm.xlu1 %2587, %v676_v14   ;;  %543 = vperm.xlu0 %2586, %v541_v15  }
  0x13   :  { %2046 = vmatprep.subr.bf16.mxu0 %v2592_v21 }
  0x14   :  { %2069 = vmatpush3.bf16.msra.mxu1 %v2812_v30 }
  0x15   :  { %2047 = vmatpush3.bf16.msra.mxu0 %v2592_v21  ;;  %2070 = vmatprep.subr.bf16.mxu1 %v2691_v13 }
  0x16   :  { %948 = vperm.xlu1 %2587, %v946_v16   ;;  %813 = vperm.xlu0 %2586, %v811_v17  }
  0x17   :  { %2048 = vmatprep.subr.bf16.mxu0 %v2593_v23 }
  0x18   :  { %2071 = vmatpush3.bf16.msra.mxu1 %v2819_v31 }
  0x19   :  { %2049 = vmatpush3.bf16.msra.mxu0 %v2593_v23  ;;  %2072 = vmatprep.subr.bf16.mxu1 %v2691_v13 }
  0x1a   :  { %1218 = vperm.xlu1 %2587, %v1216_v19   ;;  %1083 = vperm.xlu0 %2586, %v1081_v20  }
  0x1b   :  { %2050 = vmatprep.subr.bf16.mxu0 %v2594_v25 }
  0x1c   :  { %2073 = vmatpush3.bf16.msra.mxu1 %v2898_v51 }
  0x1d   :  { %2051 = vmatpush3.bf16.msra.mxu0 %v2594_v25  ;;  %2074 = vmatprep.subr.bf16.mxu1 %v2691_v13 }
  0x1e   :  { %1488 = vperm.xlu1 %2587, %v1486_v22   ;;  %1353 = vperm.xlu0 %2586, %v1351_v24  }
  0x1f   :  { %2052 = vmatprep.subr.bf16.mxu0 %v2595_v26 }
  0x20   :  { %2075 = vmatpush3.bf16.msra.mxu1 %v2906_v52 }
  0x21   :  { %2053 = vmatpush3.bf16.msra.mxu0 %v2595_v26  ;;  %2076 = vmatprep.subr.bf16.mxu1 %v2691_v13 }
  0x22   :  { %2082 = vmatprep.subr.bf16.mxu0 %v2691_v13 }
  0x24   :  { %2077 = vmatpush3.bf16.msra.mxu1 %v2916_v53 }
  0x25   :  { %2102 = vmatprep.subr.bf16.mxu1 %v2691_v13 }
  0x27   :  { %2079 = vmatmul.mubr.bf16.vlgmr.msra.gmra.mrb[0].mxu1 %v2690_v0 }
  0x28   :  { %2103 = vmatpush3.bf16.msra.mxu1 %v2924_v54  ;;  %2118 = vmatprep.mubr.msk.bf16.mxu1 %vm2692_vm8, %v2691_v13 }
  0x29   :  { %2104 = vmatprep.subr.bf16.mxu1 %v2691_v13 }
  0x2c   :  { %2105 = vmatpush3.bf16.msra.mxu1 %v2932_v55 }
  0x2d   :  { %2106 = vmatprep.subr.bf16.mxu1 %v2691_v13 }
  0x30   :  { %2107 = vmatpush3.bf16.msra.mxu1 %v2941_v56 }
  0x31   :  { %2108 = vmatprep.subr.bf16.mxu1 %v2691_v13 }
  0x34   :  { %2109 = vmatpush3.bf16.msra.mxu1 %v2948_v57 }
  0x35   :  { %2110 = vmatprep.subr.bf16.mxu1 %v2691_v13 }
  0x38   :  { %2111 = vmatpush3.bf16.msra.mxu1 %v2956_v58 }
  0x39   :  { %2112 = vmatprep.subr.bf16.mxu1 %v2691_v13 }
  0x3c   :  { %2113 = vmatpush3.bf16.msra.mxu1 %v2963_v59 }
  0x3d   :  { %2114 = vmatprep.subr.bf16.mxu1 %v2691_v13 }
  0x40   :  { %2115 = vmatpush3.bf16.msra.mxu1 %v2969_v60 }
  0x41   :  { %2116 = vmatprep.subr.bf16.mxu1 %v2691_v13 }
  0x44   :  { %2117 = vmatpush3.bf16.msra.mxu1 %v2976_v61 }
  0x45   :  { %2142 = vmatprep.subr.bf16.mxu1 %v2691_v13 }
  0x81   :  { %v94_v33 = vpop.permute.xlu1 %93  ;;  %v88_v34 = vpop.permute.xlu0 %87 }
  0x82   :  { %vm112_vm9 = vcmp.eq.s32.totalorder %v94_v33, %v85_v35  ;;  %vm110_vm12 = vcmp.eq.s32.totalorder %v88_v34, %v85_v35  ;;  %v3053_v34 = vld [vmem:[%s3602_s4 + $0x1] ss:$0 sm:$0xff] }
  0x85   :  { %v97_v36 = vpop.permute.xlu1 %96  ;;  %v91_v37 = vpop.permute.xlu0 %90 }
  0x86   :  { %vm113_vm10 = vcmp.eq.s32.totalorder %v97_v36, %v85_v35  ;;  %vm111_vm11 = vcmp.eq.s32.totalorder %v91_v37, %v85_v35 }
  0x87   :  { %vm1738_vm13 = vmpackc.low %vm113_vm10, %vm112_vm9 }
  0x88   :  { %vm1736_vm14 = vmpackc.low %vm111_vm11, %vm110_vm12 }
  0x89   :  { %2054 = vmatprep.mubr.msk.bf16.mxu0 %vm1736_vm14, %v2693_v39  ;;  %v103_v40 = vpop.permute.xlu1 %102  ;;  %v100_v41 = vpop.permute.xlu0 %99 }
  0x8a   :  { %vm115_vm15 = vcmp.eq.s32.totalorder %v103_v40, %v85_v35  ;;  %2055 = vmatmul.mubr.msk.bf16.vlgmr.msra.gmra.mrb[0].mxu0 %vm1738_vm13, %v2693_v39  ;;  %vm114_vm0 = vcmp.eq.s32.totalorder %v100_v41, %v85_v35 }
  0x8b   :  { %2083 = vmatpush3.bf16.msra.mxu0 %v2827_v38  ;;  %vm1740_vm1 = vmpackc.low %vm115_vm15, %vm114_vm0 }
  0x8c   :  { %2058 = vmatprep.mubr.msk.bf16.mxu0 %vm1740_vm1, %v2693_v39  ;;  %2084 = vmatprep.subr.bf16.mxu0 %v2691_v13 }
  0x8d   :  { %v109_v43 = vpop.permute.xlu1 %108  ;;  %v106_v44 = vpop.permute.xlu0 %105 }
  0x8e   :  { %vm117_vm2 = vcmp.eq.s32.totalorder %v109_v43, %v85_v35  ;;  %vm116_vm3 = vcmp.eq.s32.totalorder %v106_v44, %v85_v35 }
  0x8f   :  { %2085 = vmatpush3.bf16.msra.mxu0 %v2833_v42  ;;  %vm1742_vm4 = vmpackc.low %vm117_vm2, %vm116_vm3 }
  0x90   :  { %2086 = vmatprep.subr.bf16.mxu0 %v2691_v13 }
  0x91   :  { %v3016_v23 = vpop.permute.xlu0 %543 }
  0x92   :  { %2059 = vmatmul.mubr.msk.bf16.gmra.mrb[4].mxu0 %vm1742_vm4, %v2693_v39  ;;  %vm545_vm5 = vcmp.eq.s32.totalorder %v3016_v23, 1 }
  0x93   :  { %2087 = vmatpush3.bf16.msra.mxu0 %v2840_v45  ;;  %2098 = vmatprep.mubr.msk.bf16.mxu0 %vm2692_vm8, %v2691_v13  ;;  %vm3026_vm6 = vmpackc.low %vm545_vm5, %vm545_vm5 }
  0x94   :  { %2088 = vmatprep.subr.bf16.mxu0 %v2691_v13 }
  0x97   :  { %2089 = vmatpush3.bf16.msra.mxu0 %v2847_v46 }
  0x98   :  { %2090 = vmatprep.subr.bf16.mxu0 %v2691_v13 }
  0x9b   :  { %2091 = vmatpush3.bf16.msra.mxu0 %v2856_v47 }
  0x9c   :  { %2092 = vmatprep.subr.bf16.mxu0 %v2691_v13 }
  0x9f   :  { %2093 = vmatpush3.bf16.msra.mxu0 %v2863_v48 }
  0xa0   :  { %2094 = vmatprep.subr.bf16.mxu0 %v2691_v13 }
  0xa3   :  { %2095 = vmatpush3.bf16.msra.mxu0 %v2870_v49 }
  0xa4   :  { %2096 = vmatprep.subr.bf16.mxu0 %v2691_v13 }
  0xa7   :  { %2097 = vmatpush3.bf16.msra.mxu0 %v2877_v50 }
  0xa8   :  { %2122 = vmatprep.subr.bf16.mxu0 %v2691_v13 }
  0xaa   :  { %2099 = vmatmul.mubr.bf16.vlgmr.msra.gmra.mrb[8].mxu0 %v2690_v0 }
  0xab   :  { %2123 = vmatpush3.bf16.msra.mxu0 %v2792_v27  ;;  %2138 = vmatprep.mubr.msk.bf16.mxu0 %vm2692_vm8, %v2691_v13 }
  0xac   :  { %2124 = vmatprep.subr.bf16.mxu0 %v2691_v13 }
  0xaf   :  { %2125 = vmatpush3.bf16.msra.mxu0 %v2797_v28 }
  0xb0   :  { %2126 = vmatprep.subr.bf16.mxu0 %v2691_v13 }
  0xb3   :  { %2127 = vmatpush3.bf16.msra.mxu0 %v2805_v29 }
  0xb4   :  { %2128 = vmatprep.subr.bf16.mxu0 %v2691_v13 }
  0xb7   :  { %2129 = vmatpush3.bf16.msra.mxu0 %v2812_v30 }
  0xb8   :  { %2130 = vmatprep.subr.bf16.mxu0 %v2691_v13 }
  0xbb   :  { %2131 = vmatpush3.bf16.msra.mxu0 %v2819_v31 }
  0xbc   :  { %2132 = vmatprep.subr.bf16.mxu0 %v2691_v13 }
  0xbf   :  { %2133 = vmatpush3.bf16.msra.mxu0 %v2898_v51 }
  0xc0   :  { %2134 = vmatprep.subr.bf16.mxu0 %v2691_v13 }
  0xc3   :  { %2135 = vmatpush3.bf16.msra.mxu0 %v2906_v52 }
  0xc4   :  { %2136 = vmatprep.subr.bf16.mxu0 %v2691_v13 }
  0xc7   :  { %2137 = vmatpush3.bf16.msra.mxu0 %v2916_v53 }
  0xc8   :  { %2162 = vmatprep.subr.bf16.mxu0 %v2691_v13 }
  0xfa   :  { %v353_v25 = vpop.f32.mrb[0].mxu1 }
  0xfb   :  { %v2080_v26 = vpop.f32.mrb[1].mxu1 }
  0xfc   :  { %v356_v32 = vpop.f32.mrb[2].mxu1 }
  0xfd   :  { %v2081_v33 = vpop.f32.mrb[3].mxu1 }
 0x15d   :  { %v2056_v63 = vpop.f32.mrb[0].mxu0 }
 0x15e   :  { %v2984_v0 = vadd.f32 %v2056_v63, %v1727_v62  ;;  %v240_v1 = vpop.f32.mrb[1].mxu0 }
 0x15f   :  { %v2057_v2 = vpop.f32.mrb[2].mxu0  ;;  %v241_v15 = vadd.f32 %v1727_v62, %v240_v1 }
 0x160   :  { %v2986_v3 = vadd.f32 %v2057_v2, %v1727_v62  ;;  %v243_v4 = vpop.f32.mrb[3].mxu0 }
 0x161   :  { %v2988_v5 = vadd.f32 %v1727_v62, %v243_v4 }
 0x165   :  { %v2060_v6 = vpop.f32.mrb[4].mxu0 }
 0x166   :  { %v2990_v7 = vadd.f32 %v2060_v6, %v1727_v62  ;;  %v256_v8 = vpop.f32.mrb[5].mxu0  ;;  %v679_v6 = vpop.permute.xlu1 %678 }
 0x167   :  { %v2992_v9 = vadd.f32 %v1727_v62, %v256_v8  ;;  %v2061_v10 = vpop.f32.mrb[6].mxu0  ;;  %vm680_vm7 = vcmp.eq.s32.totalorder %v679_v6, 1 }
 0x168   :  { %v2994_v11 = vadd.f32 %v2061_v10, %v1727_v62  ;;  %v259_v12 = vpop.f32.mrb[7].mxu0 }
 0x169   :  { %v2996_v14 = vadd.f32 %v1727_v62, %v259_v12 }
 0x17d   :  { %v441_v16 = vpop.f32.mrb[8].mxu0 }
 0x17e   :  { %v447_v17 = vadd.f32 %v441_v16, %v241_v15  ;;  %v2100_v18 = vpop.f32.mrb[9].mxu0 }
 0x17f   :  { %v444_v19 = vpop.f32.mrb[10].mxu0 }
 0x180   :  { %2636 = vtanh.f32 %v447_v17  ;;  %v2101_v20 = vpop.f32.mrb[11].mxu0 }
 0x18a   :  { %v2998_v21 = vpop.eup %2636 }
 0x18b   :  { %v449_v22 = vpack.c.bf16 %v2998_v21, %v2998_v21 }
 0x18d   :  { %2119 = vmatmul.mubr.bf16.vlgmr.msra.gmra.mrb[4].mxu1 %v449_v22 }
 0x18e   :  { %2143 = vmatpush3.bf16.msra.mxu1 %v2827_v38  ;;  %2158 = vmatprep.mubr.msk.bf16.mxu1 %vm2692_vm8, %v2691_v13 }
 0x18f   :  { %2144 = vmatprep.subr.bf16.mxu1 %v2691_v13 }
 0x192   :  { %2145 = vmatpush3.bf16.msra.mxu1 %v2833_v42 }
 0x193   :  { %2146 = vmatprep.subr.bf16.mxu1 %v2691_v13 }
 0x196   :  { %2147 = vmatpush3.bf16.msra.mxu1 %v2840_v45 }
 0x197   :  { %2148 = vmatprep.subr.bf16.mxu1 %v2691_v13 }
 0x19a   :  { %2149 = vmatpush3.bf16.msra.mxu1 %v2847_v46 }
 0x19b   :  { %2150 = vmatprep.subr.bf16.mxu1 %v2691_v13 }
 0x19e   :  { %2151 = vmatpush3.bf16.msra.mxu1 %v2856_v47 }
 0x19f   :  { %2152 = vmatprep.subr.bf16.mxu1 %v2691_v13 }
 0x1a2   :  { %2153 = vmatpush3.bf16.msra.mxu1 %v2863_v48 }
 0x1a3   :  { %2154 = vmatprep.subr.bf16.mxu1 %v2691_v13 }
 0x1a6   :  { %2155 = vmatpush3.bf16.msra.mxu1 %v2870_v49 }
 0x1a7   :  { %2156 = vmatprep.subr.bf16.mxu1 %v2691_v13 }
 0x1aa   :  { %2157 = vmatpush3.bf16.msra.mxu1 %v2877_v50 }
 0x1ab   :  { %2182 = vmatprep.subr.bf16.mxu1 %v2691_v13 }
 0x1ad   :  { %2159 = vmatmul.mubr.msk.bf16.vlgmr.msra.gmra.mrb[8].mxu1 %vm3026_vm6, %v449_v22 }
 0x1ae   :  { %2183 = vmatpush3.bf16.msra.mxu1 %v2792_v27  ;;  %2198 = vmatprep.mubr.msk.bf16.mxu1 %vm2692_vm8, %v2691_v13 }
 0x1af   :  { %2184 = vmatprep.subr.bf16.mxu1 %v2691_v13 }
 0x1b2   :  { %2185 = vmatpush3.bf16.msra.mxu1 %v2797_v28 }
 0x1b3   :  { %2186 = vmatprep.subr.bf16.mxu1 %v2691_v13 }
 0x1b6   :  { %2187 = vmatpush3.bf16.msra.mxu1 %v2805_v29 }
 0x1b7   :  { %2188 = vmatprep.subr.bf16.mxu1 %v2691_v13 }
 0x1ba   :  { %2189 = vmatpush3.bf16.msra.mxu1 %v2812_v30 }
 0x1bb   :  { %2190 = vmatprep.subr.bf16.mxu1 %v2691_v13 }
 0x1be   :  { %2191 = vmatpush3.bf16.msra.mxu1 %v2819_v31 }
 0x1bf   :  { %2192 = vmatprep.subr.bf16.mxu1 %v2691_v13 }
 0x1c2   :  { %2193 = vmatpush3.bf16.msra.mxu1 %v2898_v51 }
 0x1c3   :  { %2194 = vmatprep.subr.bf16.mxu1 %v2691_v13 }
 0x1c6   :  { %2195 = vmatpush3.bf16.msra.mxu1 %v2906_v52 }
 0x1c7   :  { %2196 = vmatprep.subr.bf16.mxu1 %v2691_v13 }
 0x1ca   :  { %2197 = vmatpush3.bf16.msra.mxu1 %v2916_v53 }
 0x1cb   :  { %2222 = vmatprep.subr.bf16.mxu1 %v2691_v13 }
 0x260   :  { %v532_v35 = vpop.f32.mrb[4].mxu1 }
 0x261   :  { %v533_v36 = vadd.f32 %v532_v35, %v353_v25  ;;  %v2120_v37 = vpop.f32.mrb[5].mxu1 }
 0x262   :  { %v535_v39 = vpop.f32.mrb[6].mxu1 }
 0x263   :  { %v538_v40 = vadd.f32 %v3053_v34, %v533_v36  ;;  %v2121_v41 = vpop.f32.mrb[7].mxu1 }
 0x265   :  { %2638 = vtanh.f32 %v538_v40 }
 0x26f   :  { %v3056_v43 = vpop.eup %2638 }
 0x270   :  { %v1769_v44 = vpack.c.bf16 %v3056_v43, %v3056_v43  ;;  %v547_v33 = vsel %vm545_vm5, %v3056_v43, 0.0 }
 0x272   :  { %2139 = vmatmul.mubr.msk.bf16.vlgmr.msra.gmra.mrb[12].mxu0 %vm3026_vm6, %v1769_v44  ;;  %v814_v44 = vpop.permute.xlu0 %813 }
 0x273   :  { %2163 = vmatpush3.bf16.msra.mxu0 %v2924_v54  ;;  %2178 = vmatprep.mubr.msk.bf16.mxu0 %vm2692_vm8, %v2691_v13  ;;  %vm815_vm9 = vcmp.eq.s32.totalorder %v814_v44, 1 }
 0x274   :  { %2164 = vmatprep.subr.bf16.mxu0 %v2691_v13 }
 0x277   :  { %2165 = vmatpush3.bf16.msra.mxu0 %v2932_v55 }
 0x278   :  { %2166 = vmatprep.subr.bf16.mxu0 %v2691_v13 }
 0x27b   :  { %2167 = vmatpush3.bf16.msra.mxu0 %v2941_v56 }
 0x27c   :  { %2168 = vmatprep.subr.bf16.mxu0 %v2691_v13 }
 0x27f   :  { %2169 = vmatpush3.bf16.msra.mxu0 %v2948_v57 }
 0x280   :  { %v624_v62 = vpop.f32.mrb[8].mxu1  ;;  %2170 = vmatprep.subr.bf16.mxu0 %v2691_v13 }
 0x281   :  { %v630_v63 = vadd.f32 %v624_v62, %v2988_v5  ;;  %v2160_v1 = vpop.f32.mrb[9].mxu1  ;;  %v546_v5 = vsel %vm545_vm5, %v2998_v21, 0.0 }
 0x282   :  { %v627_v2 = vpop.f32.mrb[10].mxu1 }
 0x283   :  { %2640 = vtanh.f32 %v630_v63  ;;  %v2161_v4 = vpop.f32.mrb[11].mxu1  ;;  %2171 = vmatpush3.bf16.msra.mxu0 %v2956_v58 }
 0x284   :  { %2172 = vmatprep.subr.bf16.mxu0 %v2691_v13 }
 0x287   :  { %2173 = vmatpush3.bf16.msra.mxu0 %v2963_v59 }
 0x288   :  { %2174 = vmatprep.subr.bf16.mxu0 %v2691_v13 }
 0x28b   :  { %2175 = vmatpush3.bf16.msra.mxu0 %v2969_v60 }
 0x28c   :  { %2176 = vmatprep.subr.bf16.mxu0 %v2691_v13 }
 0x28d   :  { %v2641_v8 = vpop.eup %2640 }
 0x28e   :  { %v3083_v10 = vsel %vm680_vm7, %v2641_v8, %v546_v5  ;;  %v632_v12 = vpack.c.bf16 %v2641_v8, %v2641_v8 }
 0x28f   :  { %2177 = vmatpush3.bf16.msra.mxu0 %v2976_v61  ;;  %v724_v15 = vpack.c.bf16 %v3083_v10, %v3083_v10 }
 0x290   :  { %2202 = vmatprep.subr.bf16.mxu0 %v2691_v13 }
 0x292   :  { %2179 = vmatmul.mubr.bf16.vlgmr.msra.gmra.mrb[16].mxu0 %v632_v12 }
 0x293   :  { %2203 = vmatpush3.bf16.msra.mxu0 %v2827_v38  ;;  %2218 = vmatprep.mubr.msk.bf16.mxu0 %vm2692_vm8, %v2691_v13 }
 0x294   :  { %2204 = vmatprep.subr.bf16.mxu0 %v2691_v13 }
 0x297   :  { %2205 = vmatpush3.bf16.msra.mxu0 %v2833_v42 }
 0x298   :  { %2206 = vmatprep.subr.bf16.mxu0 %v2691_v13 }
 0x29b   :  { %2207 = vmatpush3.bf16.msra.mxu0 %v2840_v45 }
 0x29c   :  { %2208 = vmatprep.subr.bf16.mxu0 %v2691_v13 }
 0x29f   :  { %2209 = vmatpush3.bf16.msra.mxu0 %v2847_v46 }
 0x2a0   :  { %2210 = vmatprep.subr.bf16.mxu0 %v2691_v13 }
 0x2a3   :  { %2211 = vmatpush3.bf16.msra.mxu0 %v2856_v47 }
 0x2a4   :  { %2212 = vmatprep.subr.bf16.mxu0 %v2691_v13 }
 0x2a7   :  { %2213 = vmatpush3.bf16.msra.mxu0 %v2863_v48 }
 0x2a8   :  { %2214 = vmatprep.subr.bf16.mxu0 %v2691_v13 }
 0x2ab   :  { %2215 = vmatpush3.bf16.msra.mxu0 %v2870_v49 }
 0x2ac   :  { %2216 = vmatprep.subr.bf16.mxu0 %v2691_v13 }
 0x2af   :  { %2217 = vmatpush3.bf16.msra.mxu0 %v2877_v50 }
 0x2b0   :  { %2242 = vmatprep.subr.bf16.mxu0 %v2691_v13 }
 0x2b2   :  { %2219 = vmatmul.mubr.bf16.vlgmr.msra.gmra.mrb[20].mxu0 %v724_v15 }
 0x2b3   :  { %2243 = vmatpush3.bf16.msra.mxu0 %v2792_v27  ;;  %2258 = vmatprep.mubr.msk.bf16.mxu0 %vm2692_vm8, %v2691_v13 }
 0x2b4   :  { %2244 = vmatprep.subr.bf16.mxu0 %v2691_v13 }
 0x2b7   :  { %2245 = vmatpush3.bf16.msra.mxu0 %v2797_v28 }
 0x2b8   :  { %2246 = vmatprep.subr.bf16.mxu0 %v2691_v13 }
 0x2bb   :  { %2247 = vmatpush3.bf16.msra.mxu0 %v2805_v29 }
 0x2bc   :  { %2248 = vmatprep.subr.bf16.mxu0 %v2691_v13 }
 0x2bf   :  { %2249 = vmatpush3.bf16.msra.mxu0 %v2812_v30 }
 0x2c0   :  { %2250 = vmatprep.subr.bf16.mxu0 %v2691_v13 }
 0x2c3   :  { %2251 = vmatpush3.bf16.msra.mxu0 %v2819_v31 }
 0x2c4   :  { %2252 = vmatprep.subr.bf16.mxu0 %v2691_v13 }
 0x2c7   :  { %2253 = vmatpush3.bf16.msra.mxu0 %v2898_v51 }
 0x2c8   :  { %2254 = vmatprep.subr.bf16.mxu0 %v2691_v13 }
 0x2cb   :  { %2255 = vmatpush3.bf16.msra.mxu0 %v2906_v52 }
 0x2cc   :  { %2256 = vmatprep.subr.bf16.mxu0 %v2691_v13 }
 0x2cf   :  { %2257 = vmatpush3.bf16.msra.mxu0 %v2916_v53 }
 0x2d0   :  { %2282 = vmatprep.subr.bf16.mxu0 %v2691_v13 }
 0x345   :  { %v583_v16 = vpop.f32.mrb[12].mxu0 }
 0x346   :  { %v2140_v17 = vpop.f32.mrb[13].mxu0 }
 0x347   :  { %v586_v18 = vpop.f32.mrb[14].mxu0 }
 0x348   :  { %v2141_v19 = vpop.f32.mrb[15].mxu0 }
 0x365   :  { %v667_v20 = vpop.f32.mrb[16].mxu0 }
 0x366   :  { %v668_v21 = vadd.f32 %v667_v20, %v583_v16  ;;  %v2180_v22 = vpop.f32.mrb[17].mxu0 }
 0x367   :  { %v670_v24 = vpop.f32.mrb[18].mxu0 }
 0x368   :  { %v673_v25 = vadd.f32 %v3053_v34, %v668_v21  ;;  %v2181_v26 = vpop.f32.mrb[19].mxu0 }
 0x36a   :  { %2642 = vtanh.f32 %v673_v25 }
 0x374   :  { %v2643_v32 = vpop.eup %2642 }
 0x375   :  { %v3130_v35 = vsel %vm680_vm7, %v2643_v32, %v547_v33  ;;  %v949_v32 = vpop.permute.xlu1 %948 }
 0x376   :  { %v683_v36 = vpack.c.bf16 %v3130_v35, %v3130_v35  ;;  %vm950_vm10 = vcmp.eq.s32.totalorder %v949_v32, 1 }
 0x378   :  { %2199 = vmatmul.mubr.bf16.vlgmr.msra.gmra.mrb[12].mxu1 %v683_v36 }
 0x379   :  { %2223 = vmatpush3.bf16.msra.mxu1 %v2924_v54  ;;  %2238 = vmatprep.mubr.msk.bf16.mxu1 %vm2692_vm8, %v2691_v13 }
 0x37a   :  { %2224 = vmatprep.subr.bf16.mxu1 %v2691_v13 }
 0x37d   :  { %2225 = vmatpush3.bf16.msra.mxu1 %v2932_v55 }
 0x37e   :  { %2226 = vmatprep.subr.bf16.mxu1 %v2691_v13 }
 0x381   :  { %2227 = vmatpush3.bf16.msra.mxu1 %v2941_v56 }
 0x382   :  { %2228 = vmatprep.subr.bf16.mxu1 %v2691_v13 }
 0x385   :  { %2229 = vmatpush3.bf16.msra.mxu1 %v2948_v57  ;;  %v759_v23 = vpop.f32.mrb[20].mxu0 }
 0x386   :  { %v765_v37 = vadd.f32 %v759_v23, %v2984_v0  ;;  %v2220_v39 = vpop.f32.mrb[21].mxu0  ;;  %2230 = vmatprep.subr.bf16.mxu1 %v2691_v13 }
 0x387   :  { %v762_v40 = vpop.f32.mrb[22].mxu0 }
 0x388   :  { %v2221_v41 = vpop.f32.mrb[23].mxu0  ;;  %2644 = vtanh.f32 %v765_v37 }
 0x389   :  { %2231 = vmatpush3.bf16.msra.mxu1 %v2956_v58 }
 0x38a   :  { %2232 = vmatprep.subr.bf16.mxu1 %v2691_v13 }
 0x38d   :  { %2233 = vmatpush3.bf16.msra.mxu1 %v2963_v59 }
 0x38e   :  { %2234 = vmatprep.subr.bf16.mxu1 %v2691_v13 }
 0x391   :  { %2235 = vmatpush3.bf16.msra.mxu1 %v2969_v60 }
 0x392   :  { %2236 = vmatprep.subr.bf16.mxu1 %v2691_v13  ;;  %v2645_v43 = vpop.eup %2644 }
 0x393   :  { %v767_v0 = vpack.c.bf16 %v2645_v43, %v2645_v43  ;;  %v3171_v62 = vsel %vm815_vm9, %v2645_v43, %v3083_v10 }
 0x394   :  { %v859_v63 = vpack.c.bf16 %v3171_v62, %v3171_v62 }
 0x395   :  { %2237 = vmatpush3.bf16.msra.mxu1 %v2976_v61 }
 0x396   :  { %2262 = vmatprep.subr.bf16.mxu1 %v2691_v13 }
 0x398   :  { %2239 = vmatmul.mubr.bf16.vlgmr.msra.gmra.mrb[16].mxu1 %v767_v0 }
 0x399   :  { %2263 = vmatpush3.bf16.msra.mxu1 %v2827_v38  ;;  %2278 = vmatprep.mubr.msk.bf16.mxu1 %vm2692_vm8, %v2691_v13 }
 0x39a   :  { %2264 = vmatprep.subr.bf16.mxu1 %v2691_v13 }
 0x39d   :  { %2265 = vmatpush3.bf16.msra.mxu1 %v2833_v42 }
 0x39e   :  { %2266 = vmatprep.subr.bf16.mxu1 %v2691_v13 }
 0x3a1   :  { %2267 = vmatpush3.bf16.msra.mxu1 %v2840_v45 }
 0x3a2   :  { %2268 = vmatprep.subr.bf16.mxu1 %v2691_v13 }
 0x3a5   :  { %2269 = vmatpush3.bf16.msra.mxu1 %v2847_v46 }
 0x3a6   :  { %2270 = vmatprep.subr.bf16.mxu1 %v2691_v13 }
 0x3a9   :  { %2271 = vmatpush3.bf16.msra.mxu1 %v2856_v47 }
 0x3aa   :  { %2272 = vmatprep.subr.bf16.mxu1 %v2691_v13 }
 0x3ad   :  { %2273 = vmatpush3.bf16.msra.mxu1 %v2863_v48 }
 0x3ae   :  { %2274 = vmatprep.subr.bf16.mxu1 %v2691_v13 }
 0x3b1   :  { %2275 = vmatpush3.bf16.msra.mxu1 %v2870_v49 }
 0x3b2   :  { %2276 = vmatprep.subr.bf16.mxu1 %v2691_v13 }
 0x3b5   :  { %2277 = vmatpush3.bf16.msra.mxu1 %v2877_v50 }
 0x3b6   :  { %2302 = vmatprep.subr.bf16.mxu1 %v2691_v13 }
 0x3b8   :  { %2279 = vmatmul.mubr.bf16.vlgmr.msra.gmra.mrb[20].mxu1 %v859_v63 }
 0x3b9   :  { %2303 = vmatpush3.bf16.msra.mxu1 %v2792_v27  ;;  %2318 = vmatprep.mubr.msk.bf16.mxu1 %vm2692_vm8, %v2691_v13 }
 0x3ba   :  { %2304 = vmatprep.subr.bf16.mxu1 %v2691_v13 }
 0x3bd   :  { %2305 = vmatpush3.bf16.msra.mxu1 %v2797_v28 }
 0x3be   :  { %2306 = vmatprep.subr.bf16.mxu1 %v2691_v13 }
 0x3c1   :  { %2307 = vmatpush3.bf16.msra.mxu1 %v2805_v29 }
 0x3c2   :  { %2308 = vmatprep.subr.bf16.mxu1 %v2691_v13 }
 0x3c5   :  { %2309 = vmatpush3.bf16.msra.mxu1 %v2812_v30 }
 0x3c6   :  { %2310 = vmatprep.subr.bf16.mxu1 %v2691_v13 }
 0x3c9   :  { %2311 = vmatpush3.bf16.msra.mxu1 %v2819_v31 }
 0x3ca   :  { %2312 = vmatprep.subr.bf16.mxu1 %v2691_v13 }
 0x3cd   :  { %2313 = vmatpush3.bf16.msra.mxu1 %v2898_v51 }
 0x3ce   :  { %2314 = vmatprep.subr.bf16.mxu1 %v2691_v13 }
 0x3d1   :  { %2315 = vmatpush3.bf16.msra.mxu1 %v2906_v52 }
 0x3d2   :  { %2316 = vmatprep.subr.bf16.mxu1 %v2691_v13 }
 0x3d5   :  { %2317 = vmatpush3.bf16.msra.mxu1 %v2916_v53 }
 0x3d6   :  { %2342 = vmatprep.subr.bf16.mxu1 %v2691_v13 }
 0x44b   :  { %v718_v1 = vpop.f32.mrb[12].mxu1 }
 0x44c   :  { %v2200_v2 = vpop.f32.mrb[13].mxu1 }
 0x44d   :  { %v721_v4 = vpop.f32.mrb[14].mxu1 }
 0x44e   :  { %v2201_v6 = vpop.f32.mrb[15].mxu1 }
 0x46b   :  { %v802_v8 = vpop.f32.mrb[16].mxu1 }
 0x46c   :  { %v803_v5 = vadd.f32 %v802_v8, %v718_v1  ;;  %v2240_v10 = vpop.f32.mrb[17].mxu1 }
 0x46d   :  { %v805_v12 = vpop.f32.mrb[18].mxu1 }
 0x46e   :  { %v808_v15 = vadd.f32 %v3053_v34, %v803_v5  ;;  %v2241_v16 = vpop.f32.mrb[19].mxu1 }
 0x470   :  { %2646 = vtanh.f32 %v808_v15 }
 0x47a   :  { %v2647_v17 = vpop.eup %2646 }
 0x47b   :  { %v3198_v18 = vsel %vm815_vm9, %v2647_v17, %v3130_v35 }
 0x47c   :  { %v818_v19 = vpack.c.bf16 %v3198_v18, %v3198_v18 }
 0x47e   :  { %2259 = vmatmul.mubr.bf16.vlgmr.msra.gmra.mrb[24].mxu0 %v818_v19 }
 0x47f   :  { %2283 = vmatpush3.bf16.msra.mxu0 %v2924_v54  ;;  %2298 = vmatprep.mubr.msk.bf16.mxu0 %vm2692_vm8, %v2691_v13 }
 0x480   :  { %2284 = vmatprep.subr.bf16.mxu0 %v2691_v13 }
 0x483   :  { %2285 = vmatpush3.bf16.msra.mxu0 %v2932_v55 }
 0x484   :  { %2286 = vmatprep.subr.bf16.mxu0 %v2691_v13 }
 0x487   :  { %2287 = vmatpush3.bf16.msra.mxu0 %v2941_v56 }
 0x488   :  { %2288 = vmatprep.subr.bf16.mxu0 %v2691_v13 }
 0x48b   :  { %2289 = vmatpush3.bf16.msra.mxu0 %v2948_v57  ;;  %v894_v20 = vpop.f32.mrb[20].mxu1 }
 0x48c   :  { %v900_v21 = vadd.f32 %v894_v20, %v2986_v3  ;;  %v2280_v22 = vpop.f32.mrb[21].mxu1  ;;  %2290 = vmatprep.subr.bf16.mxu0 %v2691_v13 }
 0x48d   :  { %v897_v24 = vpop.f32.mrb[22].mxu1 }
 0x48e   :  { %v2281_v25 = vpop.f32.mrb[23].mxu1  ;;  %2648 = vtanh.f32 %v900_v21 }
 0x48f   :  { %2291 = vmatpush3.bf16.msra.mxu0 %v2956_v58 }
 0x490   :  { %2292 = vmatprep.subr.bf16.mxu0 %v2691_v13 }
 0x493   :  { %2293 = vmatpush3.bf16.msra.mxu0 %v2963_v59 }
 0x494   :  { %2294 = vmatprep.subr.bf16.mxu0 %v2691_v13 }
 0x497   :  { %2295 = vmatpush3.bf16.msra.mxu0 %v2969_v60 }
 0x498   :  { %2296 = vmatprep.subr.bf16.mxu0 %v2691_v13  ;;  %v2649_v26 = vpop.eup %2648 }
 0x499   :  { %v902_v3 = vpack.c.bf16 %v2649_v26, %v2649_v26  ;;  %v3239_v33 = vsel %vm950_vm10, %v2649_v26, %v3171_v62 }
 0x49a   :  { %v994_v35 = vpack.c.bf16 %v3239_v33, %v3239_v33 }
 0x49b   :  { %2297 = vmatpush3.bf16.msra.mxu0 %v2976_v61 }
 0x49c   :  { %2322 = vmatprep.subr.bf16.mxu0 %v2691_v13 }
 0x49e   :  { %2299 = vmatmul.mubr.bf16.vlgmr.msra.gmra.mrb[28].mxu0 %v902_v3 }
 0x49f   :  { %2323 = vmatpush3.bf16.msra.mxu0 %v2827_v38  ;;  %2338 = vmatprep.mubr.msk.bf16.mxu0 %vm2692_vm8, %v2691_v13 }
 0x4a0   :  { %2324 = vmatprep.subr.bf16.mxu0 %v2691_v13 }
 0x4a3   :  { %2325 = vmatpush3.bf16.msra.mxu0 %v2833_v42 }
 0x4a4   :  { %2326 = vmatprep.subr.bf16.mxu0 %v2691_v13 }
 0x4a7   :  { %2327 = vmatpush3.bf16.msra.mxu0 %v2840_v45 }
 0x4a8   :  { %2328 = vmatprep.subr.bf16.mxu0 %v2691_v13 }
 0x4ab   :  { %2329 = vmatpush3.bf16.msra.mxu0 %v2847_v46 }
 0x4ac   :  { %2330 = vmatprep.subr.bf16.mxu0 %v2691_v13 }
 0x4af   :  { %2331 = vmatpush3.bf16.msra.mxu0 %v2856_v47 }
 0x4b0   :  { %2332 = vmatprep.subr.bf16.mxu0 %v2691_v13 }
 0x4b3   :  { %2333 = vmatpush3.bf16.msra.mxu0 %v2863_v48 }
 0x4b4   :  { %2334 = vmatprep.subr.bf16.mxu0 %v2691_v13 }
 0x4b7   :  { %2335 = vmatpush3.bf16.msra.mxu0 %v2870_v49 }
 0x4b8   :  { %2336 = vmatprep.subr.bf16.mxu0 %v2691_v13 }
 0x4bb   :  { %2337 = vmatpush3.bf16.msra.mxu0 %v2877_v50 }
 0x4bc   :  { %2362 = vmatprep.subr.bf16.mxu0 %v2691_v13 }
 0x4be   :  { %2339 = vmatmul.mubr.bf16.vlgmr.msra.gmra.mrb[32].mxu0 %v994_v35 }
 0x4bf   :  { %2363 = vmatpush3.bf16.msra.mxu0 %v2792_v27  ;;  %2378 = vmatprep.mubr.msk.bf16.mxu0 %vm2692_vm8, %v2691_v13 }
 0x4c0   :  { %2364 = vmatprep.subr.bf16.mxu0 %v2691_v13 }
 0x4c3   :  { %2365 = vmatpush3.bf16.msra.mxu0 %v2797_v28 }
 0x4c4   :  { %2366 = vmatprep.subr.bf16.mxu0 %v2691_v13 }
 0x4c7   :  { %2367 = vmatpush3.bf16.msra.mxu0 %v2805_v29 }
 0x4c8   :  { %2368 = vmatprep.subr.bf16.mxu0 %v2691_v13 }
 0x4cb   :  { %2369 = vmatpush3.bf16.msra.mxu0 %v2812_v30 }
 0x4cc   :  { %2370 = vmatprep.subr.bf16.mxu0 %v2691_v13 }
 0x4cf   :  { %2371 = vmatpush3.bf16.msra.mxu0 %v2819_v31 }
 0x4d0   :  { %2372 = vmatprep.subr.bf16.mxu0 %v2691_v13 }
 0x4d3   :  { %2373 = vmatpush3.bf16.msra.mxu0 %v2898_v51 }
 0x4d4   :  { %2374 = vmatprep.subr.bf16.mxu0 %v2691_v13 }
 0x4d7   :  { %2375 = vmatpush3.bf16.msra.mxu0 %v2906_v52 }
 0x4d8   :  { %2376 = vmatprep.subr.bf16.mxu0 %v2691_v13 }
 0x4db   :  { %2377 = vmatpush3.bf16.msra.mxu0 %v2916_v53 }
 0x4dc   :  { %2402 = vmatprep.subr.bf16.mxu0 %v2691_v13 }
 0x551   :  { %v853_v36 = vpop.f32.mrb[24].mxu0 }
 0x552   :  { %v2260_v23 = vpop.f32.mrb[25].mxu0 }
 0x553   :  { %v856_v37 = vpop.f32.mrb[26].mxu0  ;;  %v3369_v23 = vld [vmem:[%s3601_s3 + $0x8] sm:$0xff]  }
 0x554   :  { %v2261_v39 = vpop.f32.mrb[27].mxu0  ;;  %v1219_v37 = vpop.permute.xlu1 %1218 }
 0x555   :  { %vm1220_vm12 = vcmp.eq.s32.totalorder %v1219_v37, 1  ;;  %v2674_v39 = vld [vmem:[%s3601_s3 + $0xa0] sm:$0xff]   ;;  %v2688_v37 = vld [vmem:[%s3601_s3 + $0x78] sm:$0xff]  }
 0x571   :  { %v937_v40 = vpop.f32.mrb[28].mxu0 }
 0x572   :  { %v938_v41 = vadd.f32 %v937_v40, %v853_v36  ;;  %v2300_v43 = vpop.f32.mrb[29].mxu0  ;;  %v3360_v36 = vld [vmem:[%s3601_s3] sm:$0xff]  }
 0x573   :  { %v940_v0 = vpop.f32.mrb[30].mxu0 }
 0x574   :  { %v943_v44 = vadd.f32 %v3053_v34, %v938_v41  ;;  %v2301_v62 = vpop.f32.mrb[31].mxu0 }
 0x576   :  { %2650 = vtanh.f32 %v943_v44 }
 0x580   :  { %v2651_v63 = vpop.eup %2650 }
 0x581   :  { %v3266_v1 = vsel %vm950_vm10, %v2651_v63, %v3198_v18 }
 0x582   :  { %v953_v2 = vpack.c.bf16 %v3266_v1, %v3266_v1 }
 0x584   :  { %2319 = vmatmul.mubr.bf16.vlgmr.msra.gmra.mrb[24].mxu1 %v953_v2 }
 0x585   :  { %2343 = vmatpush3.bf16.msra.mxu1 %v2924_v54  ;;  %2358 = vmatprep.mubr.msk.bf16.mxu1 %vm2692_vm8, %v2691_v13 }
 0x586   :  { %2344 = vmatprep.subr.bf16.mxu1 %v2691_v13 }
 0x589   :  { %2345 = vmatpush3.bf16.msra.mxu1 %v2932_v55 }
 0x58a   :  { %2346 = vmatprep.subr.bf16.mxu1 %v2691_v13 }
 0x58d   :  { %2347 = vmatpush3.bf16.msra.mxu1 %v2941_v56 }
 0x58e   :  { %2348 = vmatprep.subr.bf16.mxu1 %v2691_v13 }
 0x591   :  { %2349 = vmatpush3.bf16.msra.mxu1 %v2948_v57  ;;  %v1029_v4 = vpop.f32.mrb[32].mxu0 }
 0x592   :  { %v1035_v6 = vadd.f32 %v1029_v4, %v2992_v9  ;;  %v2340_v8 = vpop.f32.mrb[33].mxu0  ;;  %2350 = vmatprep.subr.bf16.mxu1 %v2691_v13 }
 0x593   :  { %v1032_v5 = vpop.f32.mrb[34].mxu0 }
 0x594   :  { %v2341_v10 = vpop.f32.mrb[35].mxu0  ;;  %2652 = vtanh.f32 %v1035_v6 }
 0x595   :  { %2351 = vmatpush3.bf16.msra.mxu1 %v2956_v58 }
 0x596   :  { %2352 = vmatprep.subr.bf16.mxu1 %v2691_v13 }
 0x599   :  { %2353 = vmatpush3.bf16.msra.mxu1 %v2963_v59 }
 0x59a   :  { %2354 = vmatprep.subr.bf16.mxu1 %v2691_v13 }
 0x59d   :  { %2355 = vmatpush3.bf16.msra.mxu1 %v2969_v60 }
 0x59e   :  { %2356 = vmatprep.subr.bf16.mxu1 %v2691_v13  ;;  %v2653_v12 = vpop.eup %2652 }
 0x59f   :  { %v1037_v9 = vpack.c.bf16 %v2653_v12, %v2653_v12 }
 0x5a1   :  { %2357 = vmatpush3.bf16.msra.mxu1 %v2976_v61 }
 0x5a2   :  { %2382 = vmatprep.subr.bf16.mxu1 %v2691_v13 }
 0x5a4   :  { %2359 = vmatmul.mubr.bf16.vlgmr.msra.gmra.mrb[28].mxu1 %v1037_v9  ;;  %v2680_v9 = vld [vmem:[%s3601_s3 + $0x38] sm:$0xff]  }
 0x5a5   :  { %2383 = vmatpush3.bf16.msra.mxu1 %v2827_v38  ;;  %2398 = vmatprep.mubr.msk.bf16.mxu1 %vm2692_vm8, %v2691_v13  ;;  %v1084_v38 = vpop.permute.xlu0 %1083 }
 0x5a6   :  { %2384 = vmatprep.subr.bf16.mxu1 %v2691_v13  ;;  %vm1085_vm11 = vcmp.eq.s32.totalorder %v1084_v38, 1 }
 0x5a9   :  { %2385 = vmatpush3.bf16.msra.mxu1 %v2833_v42  ;;  %v3307_v42 = vsel %vm1085_vm11, %v2653_v12, %v3239_v33 }
 0x5aa   :  { %2386 = vmatprep.subr.bf16.mxu1 %v2691_v13  ;;  %v1129_v15 = vpack.c.bf16 %v3307_v42, %v3307_v42 }
 0x5ad   :  { %2387 = vmatpush3.bf16.msra.mxu1 %v2840_v45 }
 0x5ae   :  { %2388 = vmatprep.subr.bf16.mxu1 %v2691_v13 }
 0x5b1   :  { %2389 = vmatpush3.bf16.msra.mxu1 %v2847_v46 }
 0x5b2   :  { %2390 = vmatprep.subr.bf16.mxu1 %v2691_v13 }
 0x5b5   :  { %2391 = vmatpush3.bf16.msra.mxu1 %v2856_v47 }
 0x5b6   :  { %2392 = vmatprep.subr.bf16.mxu1 %v2691_v13 }
 0x5b9   :  { %2393 = vmatpush3.bf16.msra.mxu1 %v2863_v48 }
 0x5ba   :  { %2394 = vmatprep.subr.bf16.mxu1 %v2691_v13 }
 0x5bd   :  { %2395 = vmatpush3.bf16.msra.mxu1 %v2870_v49 }
 0x5be   :  { %2396 = vmatprep.subr.bf16.mxu1 %v2691_v13 }
 0x5c1   :  { %2397 = vmatpush3.bf16.msra.mxu1 %v2877_v50 }
 0x5c2   :  { %2422 = vmatprep.subr.bf16.mxu1 %v2691_v13 }
 0x5c4   :  { %2399 = vmatmul.mubr.bf16.vlgmr.msra.gmra.mrb[32].mxu1 %v1129_v15 }
 0x5c5   :  { %2423 = vmatpush3.bf16.msra.mxu1 %v2792_v27  ;;  %2438 = vmatprep.mubr.msk.bf16.mxu1 %vm2692_vm8, %v2691_v13 }
 0x5c6   :  { %2424 = vmatprep.subr.bf16.mxu1 %v2691_v13 }
 0x5c9   :  { %2425 = vmatpush3.bf16.msra.mxu1 %v2797_v28 }
 0x5ca   :  { %2426 = vmatprep.subr.bf16.mxu1 %v2691_v13 }
 0x5cd   :  { %2427 = vmatpush3.bf16.msra.mxu1 %v2805_v29 }
 0x5ce   :  { %2428 = vmatprep.subr.bf16.mxu1 %v2691_v13 }
 0x5d1   :  { %2429 = vmatpush3.bf16.msra.mxu1 %v2812_v30 }
 0x5d2   :  { %2430 = vmatprep.subr.bf16.mxu1 %v2691_v13 }
 0x5d5   :  { %2431 = vmatpush3.bf16.msra.mxu1 %v2819_v31 }
 0x5d6   :  { %2432 = vmatprep.subr.bf16.mxu1 %v2691_v13 }
 0x5d9   :  { %2433 = vmatpush3.bf16.msra.mxu1 %v2898_v51 }
 0x5da   :  { %2434 = vmatprep.subr.bf16.mxu1 %v2691_v13 }
 0x5dd   :  { %2435 = vmatpush3.bf16.msra.mxu1 %v2906_v52 }
 0x5de   :  { %2436 = vmatprep.subr.bf16.mxu1 %v2691_v13 }
 0x5e1   :  { %2437 = vmatpush3.bf16.msra.mxu1 %v2916_v53 }
 0x5e2   :  { %2462 = vmatprep.subr.bf16.mxu1 %v2691_v13 }
 0x657   :  { %v988_v27 = vpop.f32.mrb[24].mxu1 }
 0x658   :  { %v2320_v28 = vpop.f32.mrb[25].mxu1 }
 0x659   :  { %v991_v29 = vpop.f32.mrb[26].mxu1 }
 0x65a   :  { %v2321_v30 = vpop.f32.mrb[27].mxu1 }
 0x677   :  { %v1072_v16 = vpop.f32.mrb[28].mxu1 }
 0x678   :  { %v1073_v31 = vadd.f32 %v1072_v16, %v988_v27  ;;  %v2360_v17 = vpop.f32.mrb[29].mxu1 }
 0x679   :  { %v1075_v18 = vpop.f32.mrb[30].mxu1 }
 0x67a   :  { %v1078_v19 = vadd.f32 %v3053_v34, %v1073_v31  ;;  %v2361_v20 = vpop.f32.mrb[31].mxu1 }
 0x67c   :  { %2654 = vtanh.f32 %v1078_v19 }
 0x686   :  { %v2655_v21 = vpop.eup %2654 }
 0x687   :  { %v3334_v22 = vsel %vm1085_vm11, %v2655_v21, %v3266_v1 }
 0x688   :  { %v1088_v24 = vpack.c.bf16 %v3334_v22, %v3334_v22 }
 0x68a   :  { %2379 = vmatmul.mubr.bf16.vlgmr.msra.gmra.mrb[36].mxu0 %v1088_v24  ;;  %v2683_v24 = vld [vmem:[%s3601_s3 + $0x50] sm:$0xff]  }
 0x68b   :  { %2403 = vmatpush3.bf16.msra.mxu0 %v2924_v54  ;;  %2418 = vmatprep.mubr.msk.bf16.mxu0 %vm2692_vm8, %v2691_v13 }
 0x68c   :  { %2404 = vmatprep.subr.bf16.mxu0 %v2691_v13 }
 0x68f   :  { %2405 = vmatpush3.bf16.msra.mxu0 %v2932_v55 }
 0x690   :  { %2406 = vmatprep.subr.bf16.mxu0 %v2691_v13 }
 0x693   :  { %2407 = vmatpush3.bf16.msra.mxu0 %v2941_v56 }
 0x694   :  { %2408 = vmatprep.subr.bf16.mxu0 %v2691_v13 }
 0x697   :  { %2409 = vmatpush3.bf16.msra.mxu0 %v2948_v57  ;;  %v1164_v25 = vpop.f32.mrb[32].mxu1 }
 0x698   :  { %v1170_v26 = vadd.f32 %v1164_v25, %v2996_v14  ;;  %v2400_v3 = vpop.f32.mrb[33].mxu1  ;;  %2410 = vmatprep.subr.bf16.mxu0 %v2691_v13  ;;  %v2684_v25 = vld [vmem:[%s3601_s3 + $0x58] sm:$0xff]  }
 0x699   :  { %v1167_v32 = vpop.f32.mrb[34].mxu1 }
 0x69a   :  { %v2401_v33 = vpop.f32.mrb[35].mxu1  ;;  %2656 = vtanh.f32 %v1170_v26 }
 0x69b   :  { %2411 = vmatpush3.bf16.msra.mxu0 %v2956_v58 }
 0x69c   :  { %2412 = vmatprep.subr.bf16.mxu0 %v2691_v13 }
 0x69f   :  { %2413 = vmatpush3.bf16.msra.mxu0 %v2963_v59 }
 0x6a0   :  { %2414 = vmatprep.subr.bf16.mxu0 %v2691_v13 }
 0x6a3   :  { %2415 = vmatpush3.bf16.msra.mxu0 %v2969_v60 }
 0x6a4   :  { %2416 = vmatprep.subr.bf16.mxu0 %v2691_v13  ;;  %v2657_v35 = vpop.eup %2656 }
 0x6a5   :  { %v1172_v14 = vpack.c.bf16 %v2657_v35, %v2657_v35 }
 0x6a7   :  { %2417 = vmatpush3.bf16.msra.mxu0 %v2976_v61 }
 0x6a8   :  { %2442 = vmatprep.subr.bf16.mxu0 %v2691_v13 }
 0x6aa   :  { %2419 = vmatmul.mubr.bf16.vlgmr.msra.gmra.mrb[40].mxu0 %v1172_v14  ;;  %v2685_v14 = vld [vmem:[%s3601_s3 + $0x60] sm:$0xff]  }
 0x6ab   :  { %2443 = vmatpush3.bf16.msra.mxu0 %v3360_v36  ;;  %2458 = vmatprep.mubr.msk.bf16.mxu0 %vm2692_vm8, %v2691_v13 }
 0x6ac   :  { %2444 = vmatprep.subr.bf16.mxu0 %v2691_v13 }
 0x6af   :  { %2445 = vmatpush3.bf16.msra.mxu0 %v3369_v23 }
 0x6b0   :  { %2446 = vmatprep.subr.bf16.mxu0 %v2691_v13 }
 0x6b3   :  { %2447 = vmatpush3.bf16.msra.mxu0 %v2840_v45  ;;  %v3385_v45 = vsel %vm1220_vm12, %v2657_v35, %v3307_v42 }
 0x6b4   :  { %2448 = vmatprep.subr.bf16.mxu0 %v2691_v13 }
 0x6b7   :  { %2449 = vmatpush3.bf16.msra.mxu0 %v2847_v46  ;;  %v1264_v46 = vpack.c.bf16 %v3385_v45, %v3385_v45 }
 0x6b8   :  { %2450 = vmatprep.subr.bf16.mxu0 %v2691_v13 }
 0x6bb   :  { %2451 = vmatpush3.bf16.msra.mxu0 %v2856_v47  ;;  %v2670_v47 = vld [vmem:[%s3601_s3 + $0x80] sm:$0xff]  }
 0x6bc   :  { %2452 = vmatprep.subr.bf16.mxu0 %v2691_v13 }
 0x6bf   :  { %2453 = vmatpush3.bf16.msra.mxu0 %v2863_v48  ;;  %v2671_v48 = vld [vmem:[%s3601_s3 + $0x88] sm:$0xff]  }
 0x6c0   :  { %2454 = vmatprep.subr.bf16.mxu0 %v2691_v13 }
 0x6c3   :  { %2455 = vmatpush3.bf16.msra.mxu0 %v2870_v49  ;;  %v2672_v49 = vld [vmem:[%s3601_s3 + $0x90] sm:$0xff]  }
 0x6c4   :  { %2456 = vmatprep.subr.bf16.mxu0 %v2691_v13 }
 0x6c7   :  { %2457 = vmatpush3.bf16.msra.mxu0 %v2877_v50  ;;  %v2673_v50 = vld [vmem:[%s3601_s3 + $0x98] sm:$0xff]  }
 0x6c8   :  { %2482 = vmatprep.subr.bf16.mxu0 %v2691_v13 }
 0x6ca   :  { %2459 = vmatmul.mubr.bf16.vlgmr.msra.gmra.mrb[44].mxu0 %v1264_v46  ;;  %v2620_v46 = vld [vmem:[%s3601_s3 + $0xc0] sm:$0xff]  }
 0x6cb   :  { %2483 = vmatpush3.bf16.msra.mxu0 %v2670_v47  ;;  %2498 = vmatprep.mubr.msk.bf16.mxu0 %vm2692_vm8, %v2691_v13  ;;  %v2621_v47 = vld [vmem:[%s3601_s3 + $0xc8] sm:$0xff]  }
 0x6cc   :  { %2484 = vmatprep.subr.bf16.mxu0 %v2691_v13 }
 0x6cf   :  { %2485 = vmatpush3.bf16.msra.mxu0 %v2671_v48  ;;  %v2622_v48 = vld [vmem:[%s3601_s3 + $0xd0] sm:$0xff]  }
 0x6d0   :  { %2486 = vmatprep.subr.bf16.mxu0 %v2691_v13 }
 0x6d3   :  { %2487 = vmatpush3.bf16.msra.mxu0 %v2672_v49  ;;  %v2623_v49 = vld [vmem:[%s3601_s3 + $0xd8] sm:$0xff]  }
 0x6d4   :  { %2488 = vmatprep.subr.bf16.mxu0 %v2691_v13 }
 0x6d7   :  { %2489 = vmatpush3.bf16.msra.mxu0 %v2673_v50  ;;  %v2624_v50 = vld [vmem:[%s3601_s3 + $0xe0] sm:$0xff]  }
 0x6d8   :  { %2490 = vmatprep.subr.bf16.mxu0 %v2691_v13 }
 0x6db   :  { %2491 = vmatpush3.bf16.msra.mxu0 %v2674_v39  ;;  %v2625_v39 = vld [vmem:[%s3601_s3 + $0xe8] sm:$0xff]  }
 0x6dc   :  { %2492 = vmatprep.subr.bf16.mxu0 %v2691_v13 }
 0x6df   :  { %2493 = vmatpush3.bf16.msra.mxu0 %v2898_v51 }
 0x6e0   :  { %2494 = vmatprep.subr.bf16.mxu0 %v2691_v13 }
 0x6e3   :  { %2495 = vmatpush3.bf16.msra.mxu0 %v2906_v52 }
 0x6e4   :  { %2496 = vmatprep.subr.bf16.mxu0 %v2691_v13 }
 0x6e7   :  { %2497 = vmatpush3.bf16.msra.mxu0 %v2916_v53 }
 0x6e8   :  { %2522 = vmatprep.subr.bf16.mxu0 %v2691_v13 }
 0x75d   :  { %v1123_v40 = vpop.f32.mrb[36].mxu0 }
 0x75e   :  { %v2380_v41 = vpop.f32.mrb[37].mxu0 }
 0x75f   :  { %v1126_v43 = vpop.f32.mrb[38].mxu0  ;;  %v2627_v41 = vld [vmem:[%s3601_s3 + $0xf8] sm:$0xff]  }
 0x760   :  { %v2381_v0 = vpop.f32.mrb[39].mxu0  ;;  %v2628_v43 = vld [vmem:[%s3601_s3 + $0x100] sm:$0xff]  }
 0x761   :  { %v2629_v0 = vld [vmem:[%s3601_s3 + $0x108] sm:$0xff]  }
 0x77d   :  { %v1207_v44 = vpop.f32.mrb[40].mxu0 }
 0x77e   :  { %v1208_v62 = vadd.f32 %v1207_v44, %v1123_v40  ;;  %v2420_v63 = vpop.f32.mrb[41].mxu0  ;;  %v2626_v40 = vld [vmem:[%s3601_s3 + $0xf0] sm:$0xff]  }
 0x77f   :  { %v1210_v1 = vpop.f32.mrb[42].mxu0  ;;  %v2630_v44 = vld [vmem:[%s3601_s3 + $0x110] sm:$0xff]   ;;  %v2632_v63 = vld [vmem:[%s3601_s3 + $0x120] sm:$0xff]  }
 0x780   :  { %v1213_v51 = vadd.f32 %v3053_v34, %v1208_v62  ;;  %v2421_v2 = vpop.f32.mrb[43].mxu0  ;;  %v2631_v62 = vld [vmem:[%s3601_s3 + $0x118] sm:$0xff]   ;;  %v2633_v1 = vld [vmem:[%s3601_s3 + $0x128] sm:$0xff]  }
 0x782   :  { %2658 = vtanh.f32 %v1213_v51 }
 0x78c   :  { %v2659_v4 = vpop.eup %2658 }
 0x78d   :  { %v3422_v52 = vsel %vm1220_vm12, %v2659_v4, %v3334_v22  ;;  %v2681_v22 = vld [vmem:[%s3601_s3 + $0x40] sm:$0xff]  }
 0x78e   :  { %v1223_v53 = vpack.c.bf16 %v3422_v52, %v3422_v52 }
 0x790   :  { %2439 = vmatmul.mubr.bf16.vlgmr.msra.gmra.mrb[36].mxu1 %v1223_v53 }
 0x791   :  { %2463 = vmatpush3.bf16.msra.mxu1 %v2924_v54  ;;  %2478 = vmatprep.mubr.msk.bf16.mxu1 %vm2692_vm8, %v2691_v13 }
 0x792   :  { %2464 = vmatprep.subr.bf16.mxu1 %v2691_v13 }
 0x795   :  { %2465 = vmatpush3.bf16.msra.mxu1 %v2932_v55 }
 0x796   :  { %2466 = vmatprep.subr.bf16.mxu1 %v2691_v13 }
 0x799   :  { %2467 = vmatpush3.bf16.msra.mxu1 %v2941_v56 }
 0x79a   :  { %2468 = vmatprep.subr.bf16.mxu1 %v2691_v13 }
 0x79d   :  { %2469 = vmatpush3.bf16.msra.mxu1 %v2948_v57  ;;  %v1299_v6 = vpop.f32.mrb[44].mxu0  ;;  %v2675_v57 = vld [vmem:[%s3601_s3 + $0x10] sm:$0xff]  }
 0x79e   :  { %v1305_v8 = vadd.f32 %v1299_v6, %v2990_v7  ;;  %v2460_v5 = vpop.f32.mrb[45].mxu0  ;;  %2470 = vmatprep.subr.bf16.mxu1 %v2691_v13  ;;  %v2679_v7 = vld [vmem:[%s3601_s3 + $0x30] sm:$0xff]  }
 0x79f   :  { %v1302_v54 = vpop.f32.mrb[46].mxu0 }
 0x7a0   :  { %v2461_v10 = vpop.f32.mrb[47].mxu0  ;;  %2660 = vtanh.f32 %v1305_v8  ;;  %v2689_v54 = vld [vmem:[%s3602_s4 + $0x1] ss:$0 sm:$0xff] }
 0x7a1   :  { %2471 = vmatpush3.bf16.msra.mxu1 %v2956_v58  ;;  %v2676_v58 = vld [vmem:[%s3601_s3 + $0x18] sm:$0xff]  }
 0x7a2   :  { %2472 = vmatprep.subr.bf16.mxu1 %v2691_v13 }
 0x7a5   :  { %2473 = vmatpush3.bf16.msra.mxu1 %v2963_v59  ;;  %v2677_v59 = vld [vmem:[%s3601_s3 + $0x20] sm:$0xff]  }
 0x7a6   :  { %2474 = vmatprep.subr.bf16.mxu1 %v2691_v13 }
 0x7a9   :  { %2475 = vmatpush3.bf16.msra.mxu1 %v2969_v60  ;;  %v2678_v60 = vld [vmem:[%s3601_s3 + $0x28] sm:$0xff]  }
 0x7aa   :  { %2476 = vmatprep.subr.bf16.mxu1 %v2691_v13  ;;  %v2661_v55 = vpop.eup %2660 }
 0x7ab   :  { %v1307_v56 = vpack.c.bf16 %v2661_v55, %v2661_v55 }
 0x7ad   :  { %2477 = vmatpush3.bf16.msra.mxu1 %v2976_v61  ;;  %v1354_v61 = vpop.permute.xlu0 %1353 }
 0x7ae   :  { %2502 = vmatprep.subr.bf16.mxu1 %v2691_v13  ;;  %vm1355_vm13 = vcmp.eq.s32.totalorder %v1354_v61, 1  ;;  %v2635_v61 = vld [vmem:[%s3601_s3 + $0x138] sm:$0xff]  }
 0x7af   :  { %v1356_v12 = vsel %vm1355_vm13, %v2661_v55, %v3385_v45 }
 0x7b0   :  { %2479 = vmatmul.mubr.bf16.vlgmr.msra.gmra.mrb[40].mxu1 %v1307_v56  ;;  %v1399_v38 = vpack.c.bf16 %v1356_v12, %v1356_v12  ;;  %v1489_v56 = vpop.permute.xlu1 %1488 }
 0x7b1   :  { %2503 = vmatpush3.bf16.msra.mxu1 %v3360_v36  ;;  %2518 = vmatprep.mubr.msk.bf16.mxu1 %vm2692_vm8, %v2691_v13  ;;  %v2686_v36 = vld [vmem:[%s3601_s3 + $0x68] sm:$0xff]  }
 0x7b2   :  { %2504 = vmatprep.subr.bf16.mxu1 %v2691_v13 }
 0x7b5   :  { %2505 = vmatpush3.bf16.msra.mxu1 %v3369_v23 }
 0x7b6   :  { %2506 = vmatprep.subr.bf16.mxu1 %v2691_v13 }
 0x7b9   :  { %2507 = vmatpush3.bf16.msra.mxu1 %v2675_v57 }
 0x7ba   :  { %2508 = vmatprep.subr.bf16.mxu1 %v2691_v13 }
 0x7bd   :  { %2509 = vmatpush3.bf16.msra.mxu1 %v2676_v58 }
 0x7be   :  { %2510 = vmatprep.subr.bf16.mxu1 %v2691_v13 }
 0x7c1   :  { %2511 = vmatpush3.bf16.msra.mxu1 %v2677_v59 }
 0x7c2   :  { %2512 = vmatprep.subr.bf16.mxu1 %v2691_v13 }
 0x7c5   :  { %2513 = vmatpush3.bf16.msra.mxu1 %v2678_v60  ;;  %v2634_v60 = vld [vmem:[%s3601_s3 + $0x130] sm:$0xff]  }
 0x7c6   :  { %2514 = vmatprep.subr.bf16.mxu1 %v2691_v13 }
 0x7c9   :  { %2515 = vmatpush3.bf16.msra.mxu1 %v2679_v7  ;;  %v1774_v7 = vld [vmem:[%s3602_s4 + $0x2] ss:$0 sm:$0xff] }
 0x7ca   :  { %2516 = vmatprep.subr.bf16.mxu1 %v2691_v13 }
 0x7cd   :  { %2517 = vmatpush3.bf16.msra.mxu1 %v2680_v9 }
 0x7ce   :  { %2542 = vmatprep.subr.bf16.mxu1 %v2691_v13 }
 0x7d0   :  { %2519 = vmatmul.mubr.bf16.vlgmr.msra.gmra.mrb[44].mxu1 %v1399_v38 }
 0x7d1   :  { %2558 = vmatprep.mubr.msk.bf16.mxu1 %vm2692_vm8, %v2691_v13  ;;  %2543 = vmatpush3.bf16.msra.mxu1 %v2620_v46 }
 0x7d2   :  { %2544 = vmatprep.subr.bf16.mxu1 %v2691_v13 }
 0x7d5   :  { %2545 = vmatpush3.bf16.msra.mxu1 %v2621_v47 }
 0x7d6   :  { %2546 = vmatprep.subr.bf16.mxu1 %v2691_v13 }
 0x7d9   :  { %2547 = vmatpush3.bf16.msra.mxu1 %v2622_v48 }
 0x7da   :  { %2548 = vmatprep.subr.bf16.mxu1 %v2691_v13 }
 0x7dd   :  { %2549 = vmatpush3.bf16.msra.mxu1 %v2623_v49 }
 0x7de   :  { %2550 = vmatprep.subr.bf16.mxu1 %v2691_v13 }
 0x7e1   :  { %2551 = vmatpush3.bf16.msra.mxu1 %v2624_v50 }
 0x7e2   :  { %2552 = vmatprep.subr.bf16.mxu1 %v2691_v13 }
 0x7e5   :  { %2553 = vmatpush3.bf16.msra.mxu1 %v2625_v39 }
 0x7e6   :  { %2554 = vmatprep.subr.bf16.mxu1 %v2691_v13 }
 0x7e9   :  { %2555 = vmatpush3.bf16.msra.mxu1 %v2626_v40 }
 0x7ea   :  { %2556 = vmatprep.subr.bf16.mxu1 %v2691_v13 }
 0x7ed   :  { %2557 = vmatpush3.bf16.msra.mxu1 %v2627_v41 }
 0x863   :  { %v1258_v42 = vpop.f32.mrb[36].mxu1 }
 0x864   :  { %v2440_v15 = vpop.f32.mrb[37].mxu1 }
 0x865   :  { %v1261_v27 = vpop.f32.mrb[38].mxu1 }
 0x866   :  { %v2441_v28 = vpop.f32.mrb[39].mxu1 }
 0x883   :  { %v1342_v29 = vpop.f32.mrb[40].mxu1 }
 0x884   :  { %v1343_v30 = vadd.f32 %v1342_v29, %v1258_v42  ;;  %v2480_v16 = vpop.f32.mrb[41].mxu1 }
 0x885   :  { %v1345_v31 = vpop.f32.mrb[42].mxu1 }
 0x886   :  { %v1348_v17 = vadd.f32 %v3053_v34, %v1343_v30  ;;  %v2481_v18 = vpop.f32.mrb[43].mxu1  ;;  %v2682_v34 = vld [vmem:[%s3601_s3 + $0x48] sm:$0xff]  }
 0x888   :  { %2662 = vtanh.f32 %v1348_v17 }
 0x892   :  { %v2663_v19 = vpop.eup %2662 }
 0x893   :  { %v3482_v20 = vsel %vm1355_vm13, %v2663_v19, %v3422_v52 }
 0x894   :  { %v1358_v21 = vpack.c.bf16 %v3482_v20, %v3482_v20 }
 0x896   :  { %2499 = vmatmul.mubr.bf16.vlgmr.msra.gmra.mrb[48].mxu0 %v1358_v21 }
 0x897   :  { %2523 = vmatpush3.bf16.msra.mxu0 %v2681_v22  ;;  %2538 = vmatprep.mubr.msk.bf16.mxu0 %vm2692_vm8, %v2691_v13 }
 0x898   :  { %2524 = vmatprep.subr.bf16.mxu0 %v2691_v13 }
 0x89b   :  { %2525 = vmatpush3.bf16.msra.mxu0 %v2682_v34 }
 0x89c   :  { %2526 = vmatprep.subr.bf16.mxu0 %v2691_v13 }
 0x89f   :  { %2527 = vmatpush3.bf16.msra.mxu0 %v2683_v24 }
 0x8a0   :  { %2528 = vmatprep.subr.bf16.mxu0 %v2691_v13 }
 0x8a3   :  { %2529 = vmatpush3.bf16.msra.mxu0 %v2684_v25  ;;  %v1434_v26 = vpop.f32.mrb[44].mxu1 }
 0x8a4   :  { %v1440_v3 = vadd.f32 %v1434_v26, %v2994_v11  ;;  %v2520_v32 = vpop.f32.mrb[45].mxu1  ;;  %2530 = vmatprep.subr.bf16.mxu0 %v2691_v13  ;;  %v2687_v11 = vld [vmem:[%s3601_s3 + $0x70] sm:$0xff]  }
 0x8a5   :  { %v1437_v33 = vpop.f32.mrb[46].mxu1 }
 0x8a6   :  { %v2521_v35 = vpop.f32.mrb[47].mxu1  ;;  %2664 = vtanh.f32 %v1440_v3 }
 0x8a7   :  { %2531 = vmatpush3.bf16.msra.mxu0 %v2685_v14 }
 0x8a8   :  { %2532 = vmatprep.subr.bf16.mxu0 %v2691_v13 }
 0x8ab   :  { %2533 = vmatpush3.bf16.msra.mxu0 %v2686_v36 }
 0x8ac   :  { %2534 = vmatprep.subr.bf16.mxu0 %v2691_v13 }
 0x8af   :  { %2535 = vmatpush3.bf16.msra.mxu0 %v2687_v11 }
 0x8b0   :  { %2536 = vmatprep.subr.bf16.mxu0 %v2691_v13  ;;  %v2665_v23 = vpop.eup %2664 }
 0x8b1   :  { %v1442_v45 = vpack.c.bf16 %v2665_v23, %v2665_v23 }
 0x8b3   :  { %2537 = vmatpush3.bf16.msra.mxu0 %v2688_v37 }
 0x8b4   :  { %2562 = vmatprep.subr.bf16.mxu0 %v2691_v13 }
 0x8b6   :  { %2539 = vmatmul.mubr.bf16.vlgmr.msra.gmra.mrb[52].mxu0 %v1442_v45 }
 0x8b7   :  { %2578 = vmatprep.mubr.msk.bf16.mxu0 %vm2692_vm8, %v2691_v13  ;;  %2563 = vmatpush3.bf16.msra.mxu0 %v2628_v43  ;;  %vm1490_vm8 = vcmp.eq.s32.totalorder %v1489_v56, 1 }
 0x8b8   :  { %2564 = vmatprep.subr.bf16.mxu0 %v2691_v13 }
 0x8bb   :  { %2565 = vmatpush3.bf16.msra.mxu0 %v2629_v0 }
 0x8bc   :  { %2566 = vmatprep.subr.bf16.mxu0 %v2691_v13 }
 0x8bf   :  { %2567 = vmatpush3.bf16.msra.mxu0 %v2630_v44 }
 0x8c0   :  { %2568 = vmatprep.subr.bf16.mxu0 %v2691_v13 }
 0x8c3   :  { %2569 = vmatpush3.bf16.msra.mxu0 %v2631_v62 }
 0x8c4   :  { %2570 = vmatprep.subr.bf16.mxu0 %v2691_v13 }
 0x8c7   :  { %2571 = vmatpush3.bf16.msra.mxu0 %v2632_v63 }
 0x8c8   :  { %2572 = vmatprep.subr.bf16.mxu0 %v2691_v13 }
 0x8cb   :  { %2573 = vmatpush3.bf16.msra.mxu0 %v2633_v1 }
 0x8cc   :  { %2574 = vmatprep.subr.bf16.mxu0 %v2691_v13 }
 0x8cf   :  { %2575 = vmatpush3.bf16.msra.mxu0 %v2634_v60 }
 0x8d0   :  { %2576 = vmatprep.subr.bf16.mxu0 %v2691_v13  ;;  %v1783_v13 = vld [vmem:[%s3602_s4 + $0x3] ss:$0 sm:$0xff] }
 0x8d3   :  { %2577 = vmatpush3.bf16.msra.mxu0 %v2635_v61 }
 0x969   :  { %v1393_v51 = vpop.f32.mrb[48].mxu0 }
 0x96a   :  { %v2500_v2 = vpop.f32.mrb[49].mxu0 }
 0x96b   :  { %v1396_v4 = vpop.f32.mrb[50].mxu0 }
 0x96c   :  { %v2501_v52 = vpop.f32.mrb[51].mxu0 }
 0x989   :  { %v1477_v53 = vpop.f32.mrb[52].mxu0 }
 0x98a   :  { %v1478_v6 = vadd.f32 %v1477_v53, %v1393_v51  ;;  %v2540_v8 = vpop.f32.mrb[53].mxu0 }
 0x98b   :  { %v1480_v5 = vpop.f32.mrb[54].mxu0 }
 0x98c   :  { %v1483_v10 = vadd.f32 %v2689_v54, %v1478_v6  ;;  %v2541_v55 = vpop.f32.mrb[55].mxu0 }
 0x98e   :  { %2666 = vtanh.f32 %v1483_v10 }
 0x998   :  { %v2667_v57 = vpop.eup %2666 }
 0x999   :  { %v1491_v58 = vsel %vm1490_vm8, %v2667_v57, %v3482_v20 }
 0x99a   :  { %v1526_v59 = vpack.c.bf16 %v1491_v58, %v1491_v58 }
 0x99c   :  { %2559 = vmatmul.mubr.bf16.vlgmr.msra.gmra.mrb[48].mxu1 %v1526_v59 }
 0xa6f   :  { %v1613_v12 = vpop.f32.mrb[48].mxu1 }
 0xa70   :  { %v1614_v9 = vadd.f32 %v1774_v7, %v1613_v12  ;;  %v2560_v38 = vpop.f32.mrb[49].mxu1 }
 0xa71   :  { %v1616_v42 = vpop.f32.mrb[50].mxu1 }
 0xa72   :  { %v1619_v15 = vmax.f32 %v1614_v9, 0.0  ;;  %v2561_v27 = vpop.f32.mrb[51].mxu1 }
 0xa74   :  { %v1620_v28 = vpack.c.bf16 %v1619_v15, %v1619_v15 }
 0xa76   :  { %2579 = vmatmul.mubr.bf16.vlgmr.msra.gmra.mrb[56].mxu0 %v1620_v28 }
 0xb49   :  { %v1707_v29 = vpop.f32.mrb[56].mxu0 }
 0xb4a   :  { %v1708_v30 = vadd.f32 %v1783_v13, %v1707_v29  ;;  %v2580_v16 = vpop.f32.mrb[57].mxu0 }
 0xb4b   :  { %v1710_v31 = vpop.f32.mrb[58].mxu0 }
 0xb4c   :  { %1713 = vst [vmem:[%s3603_s5] sm:$0xff] %v1708_v30  ;;  %v2581_v17 = vpop.f32.mrb[59].mxu0 }

</bundles_post_ra>
